<compile_context>
chip_gen: v7x
topology: tpu7x:2x2x1
jax: 0.10.0
libtpu: 0.0.40
codegen_flags: <defaults>
</compile_context>

<pallas_src>
import jax
import jax.numpy as jnp
from jax.experimental import pallas as pl
from jax.experimental.pallas import tpu as pltpu

T = 16            # sequence length
D = 32            # feature dim ("dim" in the module)
K = 15            # conv kernel size
P = (K - 1) // 2  # padding = 7


def ispu_kernel(S_ref, e_ref, Wse_ref, bse_ref, Wm_ref, bm_ref,
                W1_ref, b1_ref, W2_ref, b2_ref, out_ref):
    BT = S_ref.shape[0]          # sequences handled by this grid step
    R = BT * T                   # flattened row count for the shared-weight matmuls

    # ---- fused W_s / W_e linears: one block-diagonal matmul ------------------
    S_flat = S_ref[...].reshape(R, D)                                   # (R, D)
    e_b = jnp.broadcast_to(e_ref[...], (BT, T, D)).reshape(R, D)        # (R, D)
    x = jnp.concatenate([S_flat, e_b], axis=-1)                         # (R, 2D)
    h = jnp.dot(x, Wse_ref[...],
                preferred_element_type=jnp.float32) + bse_ref[...]      # (R, 2D)
    hs = h[:, :D]                                                       # W_s(S)
    he = h[:, D:]                                                       # W_e(e)

    # ---- gating + W_m ---------------------------------------------------------
    m = jnp.dot(hs * he, Wm_ref[...],
                preferred_element_type=jnp.float32) + bm_ref[...]       # (R, D)

    # ---- Conv1d(k=15, pad=7) as a single unfolded matmul ----------------------
    # unfold row (b, t), lane block k holds padded[b, t + k, :]  (per-sequence
    # zero halo), so one (R, K*D) @ (K*D, D) dot reproduces nn.Conv1d exactly.
    def conv(act_flat, W_ref, b_ref):
        act3 = act_flat.reshape(BT, T, D)
        halo = jnp.zeros((BT, P, D), jnp.float32)
        padded = jnp.concatenate([halo, act3, halo], axis=1)            # (BT, T+K-1, D)
        unf = jnp.concatenate([padded[:, k:k + T, :] for k in range(K)],
                              axis=-1)                                  # (BT, T, K*D)
        unf = unf.reshape(R, K * D)
        return jnp.dot(unf, W_ref[...],
                       preferred_element_type=jnp.float32) + b_ref[...]

    c1 = jnp.maximum(conv(m, W1_ref, b1_ref), 0.0)                      # ReLU
    c2 = conv(c1, W2_ref, b2_ref)

    # ---- residual: M = conv(m_tilde) + m_tilde --------------------------------
    out_ref[...] = (c2 + m).reshape(BT, T, D).astype(out_ref.dtype)


def ispu_forward(S, e, params, *, block_b=4):
    """Batched ISPU forward.

    S: (B, T, D) or (T, D);  e: (B, D) or (D,).  Returns matching batch rank.
    """
    (Ws, bs, We, be, Wm, bm, W1, b1, W2, b2) = params

    squeeze = (S.ndim == 2)
    if squeeze:
        S = S[None]
        e = e[None]
    B = S.shape[0]

    BT = min(block_b, B)
    Bp = ((B + BT - 1) // BT) * BT
    if Bp != B:
        S = jnp.concatenate([S, jnp.zeros((Bp - B, T, D), S.dtype)], axis=0)
        e = jnp.concatenate([e, jnp.zeros((Bp - B, D), e.dtype)], axis=0)

    # ---- host-side weight prep (glue, done once) ------------------------------
    # block-diagonal [[Ws^T, 0], [0, We^T]] so [S | e] @ Wse = [W_s(S) | W_e(e)]
    Wse = jnp.zeros((2 * D, 2 * D), jnp.float32)
    Wse = Wse.at[:D, :D].set(Ws.T).at[D:, D:].set(We.T)
    bse = jnp.concatenate([bs, be]).reshape(1, 2 * D)
    Wm_t = Wm.T
    # Conv1d weight (out, in, K) -> unfolded (K*D, D): row k*D+i, col o = W[o, i, k]
    W1_unf = jnp.transpose(W1, (2, 1, 0)).reshape(K * D, D)
    W2_unf = jnp.transpose(W2, (2, 1, 0)).reshape(K * D, D)
    bm2 = bm.reshape(1, D)
    b12 = b1.reshape(1, D)
    b22 = b2.reshape(1, D)

    e3 = e.reshape(Bp, 1, D)
    nb = Bp // BT

    def const(shape):
        return pl.BlockSpec(shape, lambda i: tuple(0 for _ in shape))

    out = pl.pallas_call(
        ispu_kernel,
        out_shape=jax.ShapeDtypeStruct((Bp, T, D), jnp.float32),
        grid=(nb,),
        in_specs=[
            pl.BlockSpec((BT, T, D), lambda i: (i, 0, 0)),   # S batch tile
            pl.BlockSpec((BT, 1, D), lambda i: (i, 0, 0)),   # e batch tile
            const((2 * D, 2 * D)),                           # fused Ws/We
            const((1, 2 * D)),
            const((D, D)),                                   # Wm^T
            const((1, D)),
            const((K * D, D)),                               # conv1 unfolded
            const((1, D)),
            const((K * D, D)),                               # conv2 unfolded
            const((1, D)),
        ],
        out_specs=pl.BlockSpec((BT, T, D), lambda i: (i, 0, 0)),
        compiler_params=pltpu.CompilerParams(
            dimension_semantics=("parallel",)),              # megacore split on v7x
    )(S, e3, Wse, bse, Wm_t, bm2, W1_unf, b12, W2_unf, b22)

    out = out[:B]
    return out[0] if squeeze else out


def ispu_reference_single(S, e, params):
    """Pure-JAX reference mirroring the PyTorch forward exactly (one sample)."""
    (Ws, bs, We, be, Wm, bm, W1, b1, W2, b2) = params
    hs = S @ Ws.T + bs                  # W_s(S)
    he = e @ We.T + be                  # W_e(e)
    m = (hs * he[None, :]) @ Wm.T + bm  # (T, D)
    x = m.T[None]                       # (1, D, T) == m_tilde

    def conv(x, W, b):
        y = jax.lax.conv_general_dilated(
            x, W, window_strides=(1,), padding=[(P, P)],
            dimension_numbers=('NCH', 'OIH', 'NCH'))
        return y + b[None, :, None]

    y = conv(x, W1, b1)
    y = jnp.maximum(y, 0.0)
    y = conv(y, W2, b2)
    return (y + x)[0].T                 # (T, D)


def init_params(key):
    ks = jax.random.split(key, 10)
    sc = 0.1
    Ws = sc * jax.random.normal(ks[0], (D, D), jnp.float32)
    bs = sc * jax.random.normal(ks[1], (D,), jnp.float32)
    We = sc * jax.random.normal(ks[2], (D, D), jnp.float32)
    be = sc * jax.random.normal(ks[3], (D,), jnp.float32)
    Wm = sc * jax.random.normal(ks[4], (D, D), jnp.float32)
    bm = sc * jax.random.normal(ks[5], (D,), jnp.float32)
    W1 = sc * jax.random.normal(ks[6], (D, D, K), jnp.float32)
    b1 = sc * jax.random.normal(ks[7], (D,), jnp.float32)
    W2 = sc * jax.random.normal(ks[8], (D, D, K), jnp.float32)
    b2 = sc * jax.random.normal(ks[9], (D,), jnp.float32)
    return (Ws, bs, We, be, Wm, bm, W1, b1, W2, b2)


if __name__ == "__main__":
    key = jax.random.PRNGKey(0)
    kS, ke, kp = jax.random.split(key, 3)
    B = 8
    S = jax.random.normal(kS, (B, T, D), jnp.float32)
    e = jax.random.normal(ke, (B, D), jnp.float32)
    params = init_params(kp)

    # batched path (grid over batch tiles)
    out = ispu_forward(S, e, params)
    out = jax.block_until_ready(out)
    ref = jax.vmap(lambda s, ev: ispu_reference_single(s, ev, params))(S, e)
    assert out.shape == (B, T, D)
    assert jnp.allclose(out, ref, rtol=1e-4, atol=1e-4), (
        float(jnp.max(jnp.abs(out - ref))))

    # single-sample path (matches the original module signature exactly)
    out1 = jax.block_until_ready(ispu_forward(S[0], e[0], params))
    assert out1.shape == (T, D)
    assert jnp.allclose(out1, ref[0], rtol=1e-4, atol=1e-4), (
        float(jnp.max(jnp.abs(out1 - ref[0]))))

    print("KERNEL_OK")
</pallas_src>

<mosaic_0001>
module attributes {stable_mosaic.version = 11 : i64} {
  func.func @ispu_kernel(%arg0: i32, %arg1: memref<4x16x32xf32, #tpu.memory_space<vmem>>, %arg2: memref<4x1x32xf32, #tpu.memory_space<vmem>>, %arg3: memref<64x64xf32, #tpu.memory_space<vmem>>, %arg4: memref<1x64xf32, #tpu.memory_space<vmem>>, %arg5: memref<32x32xf32, #tpu.memory_space<vmem>>, %arg6: memref<1x32xf32, #tpu.memory_space<vmem>>, %arg7: memref<480x32xf32, #tpu.memory_space<vmem>>, %arg8: memref<1x32xf32, #tpu.memory_space<vmem>>, %arg9: memref<480x32xf32, #tpu.memory_space<vmem>>, %arg10: memref<1x32xf32, #tpu.memory_space<vmem>>, %arg11: memref<4x16x32xf32, #tpu.memory_space<vmem>>) attributes {dimension_semantics = [#tpu.dimension_semantics<parallel>], iteration_bounds = array<i64: 2>, scalar_prefetch = 0 : i64, scratch_operands = 0 : i64, tpu.core_type = #tpu.core_type<tc>, window_params = [{transform_indices = @transform_0, window_bounds = array<i64: 4, 16, 32>}, {transform_indices = @transform_1, window_bounds = array<i64: 4, 1, 32>}, {pipeline_mode = #tpu.pipeline_mode<synchronous>, transform_indices = @transform_2, window_bounds = array<i64: 64, 64>}, {pipeline_mode = #tpu.pipeline_mode<synchronous>, transform_indices = @transform_3, window_bounds = array<i64: 1, 64>}, {pipeline_mode = #tpu.pipeline_mode<synchronous>, transform_indices = @transform_4, window_bounds = array<i64: 32, 32>}, {pipeline_mode = #tpu.pipeline_mode<synchronous>, transform_indices = @transform_5, window_bounds = array<i64: 1, 32>}, {pipeline_mode = #tpu.pipeline_mode<synchronous>, transform_indices = @transform_6, window_bounds = array<i64: 480, 32>}, {pipeline_mode = #tpu.pipeline_mode<synchronous>, transform_indices = @transform_7, window_bounds = array<i64: 1, 32>}, {pipeline_mode = #tpu.pipeline_mode<synchronous>, transform_indices = @transform_8, window_bounds = array<i64: 480, 32>}, {pipeline_mode = #tpu.pipeline_mode<synchronous>, transform_indices = @transform_9, window_bounds = array<i64: 1, 32>}, {transform_indices = @transform_10, window_bounds = array<i64: 4, 16, 32>}]} {
    %c0 = arith.constant 0 : index
    %c0_0 = arith.constant 0 : index
    %c0_1 = arith.constant 0 : index
    %0 = vector.load %arg1[%c0, %c0_0, %c0_1] : memref<4x16x32xf32, #tpu.memory_space<vmem>>, vector<4x16x32xf32>
    %1 = vector.shape_cast %0 : vector<4x16x32xf32> to vector<64x32xf32>
    %c0_2 = arith.constant 0 : index
    %c0_3 = arith.constant 0 : index
    %c0_4 = arith.constant 0 : index
    %2 = vector.load %arg2[%c0_2, %c0_3, %c0_4] : memref<4x1x32xf32, #tpu.memory_space<vmem>>, vector<4x1x32xf32>
    %3 = vector.shape_cast %2 : vector<4x1x32xf32> to vector<4x1x32xf32>
    %4 = vector.broadcast %3 : vector<4x1x32xf32> to vector<4x16x32xf32>
    %5 = vector.shape_cast %4 : vector<4x16x32xf32> to vector<64x32xf32>
    %6 = tpu.concatenate %1, %5 in 1 : vector<64x32xf32>, vector<64x32xf32> -> vector<64x64xf32>
    %c0_5 = arith.constant 0 : index
    %c0_6 = arith.constant 0 : index
    %7 = vector.load %arg3[%c0_5, %c0_6] : memref<64x64xf32, #tpu.memory_space<vmem>>, vector<64x64xf32>
    %cst = arith.constant dense<0.000000e+00> : vector<64x64xf32>
    %8 = tpu.matmul %6, %7, %cst {dimension_numbers = #tpu.dot_dimension_numbers<[1], [0], [0], [1], [0, 0, 1, 1], [], []>} : vector<64x64xf32>, vector<64x64xf32>, vector<64x64xf32> -> vector<64x64xf32>
    %c0_7 = arith.constant 0 : index
    %c0_8 = arith.constant 0 : index
    %9 = vector.load %arg4[%c0_7, %c0_8] : memref<1x64xf32, #tpu.memory_space<vmem>>, vector<1x64xf32>
    %10 = vector.broadcast %9 : vector<1x64xf32> to vector<64x64xf32>
    %11 = arith.addf %8, %10 : vector<64x64xf32>
    %12 = vector.extract_strided_slice %11 {offsets = [0, 0], sizes = [64, 32], strides = [1, 1]} : vector<64x64xf32> to vector<64x32xf32>
    %13 = vector.extract_strided_slice %11 {offsets = [0, 32], sizes = [64, 32], strides = [1, 1]} : vector<64x64xf32> to vector<64x32xf32>
    %14 = arith.mulf %12, %13 : vector<64x32xf32>
    %c0_9 = arith.constant 0 : index
    %c0_10 = arith.constant 0 : index
    %15 = vector.load %arg5[%c0_9, %c0_10] : memref<32x32xf32, #tpu.memory_space<vmem>>, vector<32x32xf32>
    %cst_11 = arith.constant dense<0.000000e+00> : vector<64x32xf32>
    %16 = tpu.matmul %14, %15, %cst_11 {dimension_numbers = #tpu.dot_dimension_numbers<[1], [0], [0], [1], [0, 0, 1, 1], [], []>} : vector<64x32xf32>, vector<32x32xf32>, vector<64x32xf32> -> vector<64x32xf32>
    %c0_12 = arith.constant 0 : index
    %c0_13 = arith.constant 0 : index
    %17 = vector.load %arg6[%c0_12, %c0_13] : memref<1x32xf32, #tpu.memory_space<vmem>>, vector<1x32xf32>
    %18 = vector.broadcast %17 : vector<1x32xf32> to vector<64x32xf32>
    %19 = arith.addf %16, %18 : vector<64x32xf32>
    %20 = vector.shape_cast %19 : vector<64x32xf32> to vector<4x16x32xf32>
    %cst_14 = arith.constant 0.000000e+00 : f32
    %21 = vector.broadcast %cst_14 : f32 to vector<4x7x32xf32>
    %22 = tpu.concatenate %21, %20, %21 in 1 : vector<4x7x32xf32>, vector<4x16x32xf32>, vector<4x7x32xf32> -> vector<4x30x32xf32>
    %23 = vector.extract_strided_slice %22 {offsets = [0, 0, 0], sizes = [4, 16, 32], strides = [1, 1, 1]} : vector<4x30x32xf32> to vector<4x16x32xf32>
    %24 = vector.extract_strided_slice %22 {offsets = [0, 1, 0], sizes = [4, 16, 32], strides = [1, 1, 1]} : vector<4x30x32xf32> to vector<4x16x32xf32>
    %25 = vector.extract_strided_slice %22 {offsets = [0, 2, 0], sizes = [4, 16, 32], strides = [1, 1, 1]} : vector<4x30x32xf32> to vector<4x16x32xf32>
    %26 = vector.extract_strided_slice %22 {offsets = [0, 3, 0], sizes = [4, 16, 32], strides = [1, 1, 1]} : vector<4x30x32xf32> to vector<4x16x32xf32>
    %27 = vector.extract_strided_slice %22 {offsets = [0, 4, 0], sizes = [4, 16, 32], strides = [1, 1, 1]} : vector<4x30x32xf32> to vector<4x16x32xf32>
    %28 = vector.extract_strided_slice %22 {offsets = [0, 5, 0], sizes = [4, 16, 32], strides = [1, 1, 1]} : vector<4x30x32xf32> to vector<4x16x32xf32>
    %29 = vector.extract_strided_slice %22 {offsets = [0, 6, 0], sizes = [4, 16, 32], strides = [1, 1, 1]} : vector<4x30x32xf32> to vector<4x16x32xf32>
    %30 = vector.extract_strided_slice %22 {offsets = [0, 7, 0], sizes = [4, 16, 32], strides = [1, 1, 1]} : vector<4x30x32xf32> to vector<4x16x32xf32>
    %31 = vector.extract_strided_slice %22 {offsets = [0, 8, 0], sizes = [4, 16, 32], strides = [1, 1, 1]} : vector<4x30x32xf32> to vector<4x16x32xf32>
    %32 = vector.extract_strided_slice %22 {offsets = [0, 9, 0], sizes = [4, 16, 32], strides = [1, 1, 1]} : vector<4x30x32xf32> to vector<4x16x32xf32>
    %33 = vector.extract_strided_slice %22 {offsets = [0, 10, 0], sizes = [4, 16, 32], strides = [1, 1, 1]} : vector<4x30x32xf32> to vector<4x16x32xf32>
    %34 = vector.extract_strided_slice %22 {offsets = [0, 11, 0], sizes = [4, 16, 32], strides = [1, 1, 1]} : vector<4x30x32xf32> to vector<4x16x32xf32>
    %35 = vector.extract_strided_slice %22 {offsets = [0, 12, 0], sizes = [4, 16, 32], strides = [1, 1, 1]} : vector<4x30x32xf32> to vector<4x16x32xf32>
    %36 = vector.extract_strided_slice %22 {offsets = [0, 13, 0], sizes = [4, 16, 32], strides = [1, 1, 1]} : vector<4x30x32xf32> to vector<4x16x32xf32>
    %37 = vector.extract_strided_slice %22 {offsets = [0, 14, 0], sizes = [4, 16, 32], strides = [1, 1, 1]} : vector<4x30x32xf32> to vector<4x16x32xf32>
    %38 = tpu.concatenate %23, %24, %25, %26, %27, %28, %29, %30, %31, %32, %33, %34, %35, %36, %37 in 2 : vector<4x16x32xf32>, vector<4x16x32xf32>, vector<4x16x32xf32>, vector<4x16x32xf32>, vector<4x16x32xf32>, vector<4x16x32xf32>, vector<4x16x32xf32>, vector<4x16x32xf32>, vector<4x16x32xf32>, vector<4x16x32xf32>, vector<4x16x32xf32>, vector<4x16x32xf32>, vector<4x16x32xf32>, vector<4x16x32xf32>, vector<4x16x32xf32> -> vector<4x16x480xf32>
    %39 = vector.shape_cast %38 : vector<4x16x480xf32> to vector<64x480xf32>
    %c0_15 = arith.constant 0 : index
    %c0_16 = arith.constant 0 : index
    %40 = vector.load %arg7[%c0_15, %c0_16] : memref<480x32xf32, #tpu.memory_space<vmem>>, vector<480x32xf32>
    %cst_17 = arith.constant dense<0.000000e+00> : vector<64x32xf32>
    %41 = tpu.matmul %39, %40, %cst_17 {dimension_numbers = #tpu.dot_dimension_numbers<[1], [0], [0], [1], [0, 0, 1, 1], [], []>} : vector<64x480xf32>, vector<480x32xf32>, vector<64x32xf32> -> vector<64x32xf32>
    %c0_18 = arith.constant 0 : index
    %c0_19 = arith.constant 0 : index
    %42 = vector.load %arg8[%c0_18, %c0_19] : memref<1x32xf32, #tpu.memory_space<vmem>>, vector<1x32xf32>
    %43 = vector.broadcast %42 : vector<1x32xf32> to vector<64x32xf32>
    %44 = arith.addf %41, %43 : vector<64x32xf32>
    %cst_20 = arith.constant 0.000000e+00 : f32
    %45 = vector.broadcast %cst_20 : f32 to vector<64x32xf32>
    %46 = arith.maximumf %44, %45 : vector<64x32xf32>
    %47 = vector.shape_cast %46 : vector<64x32xf32> to vector<4x16x32xf32>
    %cst_21 = arith.constant 0.000000e+00 : f32
    %48 = vector.broadcast %cst_21 : f32 to vector<4x7x32xf32>
    %49 = tpu.concatenate %48, %47, %48 in 1 : vector<4x7x32xf32>, vector<4x16x32xf32>, vector<4x7x32xf32> -> vector<4x30x32xf32>
    %50 = vector.extract_strided_slice %49 {offsets = [0, 0, 0], sizes = [4, 16, 32], strides = [1, 1, 1]} : vector<4x30x32xf32> to vector<4x16x32xf32>
    %51 = vector.extract_strided_slice %49 {offsets = [0, 1, 0], sizes = [4, 16, 32], strides = [1, 1, 1]} : vector<4x30x32xf32> to vector<4x16x32xf32>
    %52 = vector.extract_strided_slice %49 {offsets = [0, 2, 0], sizes = [4, 16, 32], strides = [1, 1, 1]} : vector<4x30x32xf32> to vector<4x16x32xf32>
    %53 = vector.extract_strided_slice %49 {offsets = [0, 3, 0], sizes = [4, 16, 32], strides = [1, 1, 1]} : vector<4x30x32xf32> to vector<4x16x32xf32>
    %54 = vector.extract_strided_slice %49 {offsets = [0, 4, 0], sizes = [4, 16, 32], strides = [1, 1, 1]} : vector<4x30x32xf32> to vector<4x16x32xf32>
    %55 = vector.extract_strided_slice %49 {offsets = [0, 5, 0], sizes = [4, 16, 32], strides = [1, 1, 1]} : vector<4x30x32xf32> to vector<4x16x32xf32>
    %56 = vector.extract_strided_slice %49 {offsets = [0, 6, 0], sizes = [4, 16, 32], strides = [1, 1, 1]} : vector<4x30x32xf32> to vector<4x16x32xf32>
    %57 = vector.extract_strided_slice %49 {offsets = [0, 7, 0], sizes = [4, 16, 32], strides = [1, 1, 1]} : vector<4x30x32xf32> to vector<4x16x32xf32>
    %58 = vector.extract_strided_slice %49 {offsets = [0, 8, 0], sizes = [4, 16, 32], strides = [1, 1, 1]} : vector<4x30x32xf32> to vector<4x16x32xf32>
    %59 = vector.extract_strided_slice %49 {offsets = [0, 9, 0], sizes = [4, 16, 32], strides = [1, 1, 1]} : vector<4x30x32xf32> to vector<4x16x32xf32>
    %60 = vector.extract_strided_slice %49 {offsets = [0, 10, 0], sizes = [4, 16, 32], strides = [1, 1, 1]} : vector<4x30x32xf32> to vector<4x16x32xf32>
    %61 = vector.extract_strided_slice %49 {offsets = [0, 11, 0], sizes = [4, 16, 32], strides = [1, 1, 1]} : vector<4x30x32xf32> to vector<4x16x32xf32>
    %62 = vector.extract_strided_slice %49 {offsets = [0, 12, 0], sizes = [4, 16, 32], strides = [1, 1, 1]} : vector<4x30x32xf32> to vector<4x16x32xf32>
    %63 = vector.extract_strided_slice %49 {offsets = [0, 13, 0], sizes = [4, 16, 32], strides = [1, 1, 1]} : vector<4x30x32xf32> to vector<4x16x32xf32>
    %64 = vector.extract_strided_slice %49 {offsets = [0, 14, 0], sizes = [4, 16, 32], strides = [1, 1, 1]} : vector<4x30x32xf32> to vector<4x16x32xf32>
    %65 = tpu.concatenate %50, %51, %52, %53, %54, %55, %56, %57, %58, %59, %60, %61, %62, %63, %64 in 2 : vector<4x16x32xf32>, vector<4x16x32xf32>, vector<4x16x32xf32>, vector<4x16x32xf32>, vector<4x16x32xf32>, vector<4x16x32xf32>, vector<4x16x32xf32>, vector<4x16x32xf32>, vector<4x16x32xf32>, vector<4x16x32xf32>, vector<4x16x32xf32>, vector<4x16x32xf32>, vector<4x16x32xf32>, vector<4x16x32xf32>, vector<4x16x32xf32> -> vector<4x16x480xf32>
    %66 = vector.shape_cast %65 : vector<4x16x480xf32> to vector<64x480xf32>
    %c0_22 = arith.constant 0 : index
    %c0_23 = arith.constant 0 : index
    %67 = vector.load %arg9[%c0_22, %c0_23] : memref<480x32xf32, #tpu.memory_space<vmem>>, vector<480x32xf32>
    %cst_24 = arith.constant dense<0.000000e+00> : vector<64x32xf32>
    %68 = tpu.matmul %66, %67, %cst_24 {dimension_numbers = #tpu.dot_dimension_numbers<[1], [0], [0], [1], [0, 0, 1, 1], [], []>} : vector<64x480xf32>, vector<480x32xf32>, vector<64x32xf32> -> vector<64x32xf32>
    %c0_25 = arith.constant 0 : index
    %c0_26 = arith.constant 0 : index
    %69 = vector.load %arg10[%c0_25, %c0_26] : memref<1x32xf32, #tpu.memory_space<vmem>>, vector<1x32xf32>
    %70 = vector.broadcast %69 : vector<1x32xf32> to vector<64x32xf32>
    %71 = arith.addf %68, %70 : vector<64x32xf32>
    %72 = arith.addf %71, %19 : vector<64x32xf32>
    %73 = vector.shape_cast %72 : vector<64x32xf32> to vector<4x16x32xf32>
    %c0_27 = arith.constant 0 : index
    %c0_28 = arith.constant 0 : index
    %c0_29 = arith.constant 0 : index
    %74 = vector.load %arg11[%c0_27, %c0_28, %c0_29] : memref<4x16x32xf32, #tpu.memory_space<vmem>>, vector<4x16x32xf32>
    tpu.vector_store %arg11[%c0_27, %c0_28, %c0_29], %73 {strides = array<i32>} : memref<4x16x32xf32, #tpu.memory_space<vmem>>, vector<4x16x32xf32>,
    return
  }
  func.func @transform_0(%arg0: i32) -> (i32, i32, i32) {
    %c0_i32 = arith.constant 0 : i32
    %c0_i32_0 = arith.constant 0 : i32
    %c0_i32_1 = arith.constant 0 : i32
    return %arg0, %c0_i32, %c0_i32_0 : i32, i32, i32
  }
  func.func @transform_1(%arg0: i32) -> (i32, i32, i32) {
    %c0_i32 = arith.constant 0 : i32
    %c0_i32_0 = arith.constant 0 : i32
    %c0_i32_1 = arith.constant 0 : i32
    return %arg0, %c0_i32, %c0_i32_0 : i32, i32, i32
  }
  func.func @transform_2(%arg0: i32) -> (i32, i32) {
    %c0_i32 = arith.constant 0 : i32
    %c0_i32_0 = arith.constant 0 : i32
    %c0_i32_1 = arith.constant 0 : i32
    return %c0_i32, %c0_i32_0 : i32, i32
  }
  func.func @transform_3(%arg0: i32) -> (i32, i32) {
    %c0_i32 = arith.constant 0 : i32
    %c0_i32_0 = arith.constant 0 : i32
    %c0_i32_1 = arith.constant 0 : i32
    return %c0_i32, %c0_i32_0 : i32, i32
  }
  func.func @transform_4(%arg0: i32) -> (i32, i32) {
    %c0_i32 = arith.constant 0 : i32
    %c0_i32_0 = arith.constant 0 : i32
    %c0_i32_1 = arith.constant 0 : i32
    return %c0_i32, %c0_i32_0 : i32, i32
  }
  func.func @transform_5(%arg0: i32) -> (i32, i32) {
    %c0_i32 = arith.constant 0 : i32
    %c0_i32_0 = arith.constant 0 : i32
    %c0_i32_1 = arith.constant 0 : i32
    return %c0_i32, %c0_i32_0 : i32, i32
  }
  func.func @transform_6(%arg0: i32) -> (i32, i32) {
    %c0_i32 = arith.constant 0 : i32
    %c0_i32_0 = arith.constant 0 : i32
    %c0_i32_1 = arith.constant 0 : i32
    return %c0_i32, %c0_i32_0 : i32, i32
  }
  func.func @transform_7(%arg0: i32) -> (i32, i32) {
    %c0_i32 = arith.constant 0 : i32
    %c0_i32_0 = arith.constant 0 : i32
    %c0_i32_1 = arith.constant 0 : i32
    return %c0_i32, %c0_i32_0 : i32, i32
  }
  func.func @transform_8(%arg0: i32) -> (i32, i32) {
    %c0_i32 = arith.constant 0 : i32
    %c0_i32_0 = arith.constant 0 : i32
    %c0_i32_1 = arith.constant 0 : i32
    return %c0_i32, %c0_i32_0 : i32, i32
  }
  func.func @transform_9(%arg0: i32) -> (i32, i32) {
    %c0_i32 = arith.constant 0 : i32
    %c0_i32_0 = arith.constant 0 : i32
    %c0_i32_1 = arith.constant 0 : i32
    return %c0_i32, %c0_i32_0 : i32, i32
  }
  func.func @transform_10(%arg0: i32) -> (i32, i32, i32) {
    %c0_i32 = arith.constant 0 : i32
    %c0_i32_0 = arith.constant 0 : i32
    %c0_i32_1 = arith.constant 0 : i32
    return %arg0, %c0_i32, %c0_i32_0 : i32, i32, i32
  }
}

</mosaic_0001>

<bundles_post_ra>
// kernel: tpu_custom_call.1
= control target key start
LH: loop header
LB: loop body
LE: loop exit
PB: predicated region body
PF: predicated region fallthrough
CT: control target
= control target key end

     0   :  { %s4825_s0 = inlined_call_operand.vmem [shape: f32[8,16,32], index: 0, kind: input, shape index: {}]   ;;  %s4826_s1 = inlined_call_operand.vmem [shape: f32[8,1,32], index: 1, kind: input, shape index: {}]   ;;  %s4827_s2 = inlined_call_operand.vmem [shape: f32[64,64], index: 2, kind: input, shape index: {}]   ;;  %s4828_s3 = inlined_call_operand.vmem [shape: f32[1,64], index: 3, kind: input, shape index: {}]   ;;  %s4829_s4 = inlined_call_operand.vmem [shape: f32[32,32], index: 4, kind: input, shape index: {}]   ;;  %s4830_s5 = inlined_call_operand.vmem [shape: f32[1,32], index: 5, kind: input, shape index: {}]   ;;  %s4831_s6 = inlined_call_operand.vmem [shape: f32[480,32], index: 6, kind: input, shape index: {}]   ;;  %s4832_s7 = inlined_call_operand.vmem [shape: f32[1,32], index: 7, kind: input, shape index: {}]   ;;  %s4833_s8 = inlined_call_operand.vmem [shape: f32[480,32], index: 8, kind: input, shape index: {}]   ;;  %s4834_s9 = inlined_call_operand.vmem [shape: f32[1,32], index: 9, kind: input, shape index: {}]   ;;  %s4835_s10 = inlined_call_operand.hbm [shape: f32[8,16,32], index: 10, kind: output, shape index: {}]  }
   0x1   :  { %4842 = sst [smem:[#allocation5_spill]] %s4825_s0 }
   0x2   :  { %4843 = sst [smem:[#allocation6_spill]] %s4826_s1 }
   0x3   :  { %15 = vsyncpa [#allocation3], 0 }
   0x4   :  { %17 = vsyncpa [#allocation3 + $0x1], 0  ;;  %s3311_s13 = smov 0   ;;  %s3313_s14 = smov 0  }
   0x5   :  { %s3315_s15 = smov 0   ;;  %s3317_s16 = smov 0  }
   0x6 LB: > { %s3332_s17 = sadd.s32 4294967295, %s3246_s16   ;;  %s2480_s18 = sadd.s32 4294967294, %s3246_s16   ;;  %s3246_s16 = sphi %s3317_s16, %s4854_s16   ;;  %s3242_s15 = sphi %s3315_s15, %s4853_s15   ;;  %s3238_s14 = sphi %s3313_s14, %s4852_s14   ;;  %s3234_s13 = sphi %s3311_s13, %s4851_s13  }
   0x7   : > { %s3336_s19 = sadd.s32 1, %s3246_s16   ;;  %s250_s20 = sadd.s32 1, %s3242_s15 }
   0x8   : > { %s247_s21 = ssub.s32 %s3246_s16, %s3336_s19  ;;  %p260_p0 = scmp.ne.s32.totalorder %s3242_s15, %s3238_s14 }
   0x9   : > { %p248_p1 = scmp.eq.s32.totalorder %s247_s21, 0  ;;  %p261_p2 = scmp.eq.s32.totalorder %s3332_s17, 1 }
   0xa   : > { %p266_p3 = scmp.ne.s32.totalorder %s3238_s14, %s3234_s13  ;;  %p267_p4 = scmp.eq.s32.totalorder %s2480_s18, 1 }
   0xb   : > { %s3347_s22 = scalar_select %p248_p1, %s3242_s15, %s250_s20  }
   0xc   : > { %p3349_p5 = por %p261_p2, %p260_p0  ;;  %p3353_p6 = por %p267_p4, %p266_p3 }
   0xd   : > { %p2483_p7 = scmp.ge.s32.totalorder %s3246_s16, 1  ;;  %p327_p8 = scmp.lt.s32.totalorder %s3246_s16, 3 }
   0xf   : > { %p328_p9 = pnand %p2483_p7, %p327_p8 }
  0x10   : > { %s2485_s25 = sshll.u32 (!%p328_p9), %s3332_s17, 2  ;;  %v436_v0 = vld [vmem:[%s4827_s2] sm:$0xff] (!%p328_p9)  ;;  %v437_v1 = vld [vmem:[%s4827_s2 + $0x8] sm:$0xff] (!%p328_p9)  ;;  %v438_v2 = vld [vmem:[%s4827_s2 + $0x10] sm:$0xff] (!%p328_p9)  ;;  %s4846_s1 = sld [smem:[#allocation6_spill]] (!%p328_p9)  ;;  %vm427_vm0 = vcmask (!%p328_p9), 261120  }
  0x11   : > { %331 = sbr.rel (%p328_p9) target bundleno = 1510 (0x5e6), region = 60  ;;  %p371_p10 = scmp.lt.s32.totalorder (!%p328_p9), %s2485_s25, 7  ;;  %v2726_v3 = vpack.c.bf16 (!%p328_p9), %v437_v1, %v436_v0  ;;  %v439_v4 = vld [vmem:[%s4827_s2 + $0x18] sm:$0xff] (!%p328_p9)  ;;  %v440_v6 = vld [vmem:[%s4827_s2 + $0x20] sm:$0xff] (!%p328_p9)  ;;  %v441_v7 = vld [vmem:[%s4827_s2 + $0x28] sm:$0xff] (!%p328_p9)  ;;  %vm451_vm1 = vcmask (!%p328_p9), 523264  }
  0x12   : > { %v2730_v5 = vpack.c.bf16 (!%p328_p9), %v439_v4, %v438_v2  ;;  %v2734_v8 = vpack.c.bf16 (!%p328_p9), %v441_v7, %v440_v6  ;;  %v442_v9 = vld [vmem:[%s4827_s2 + $0x30] sm:$0xff] (!%p328_p9)  ;;  %v443_v12 = vld [vmem:[%s4827_s2 + $0x38] sm:$0xff] (!%p328_p9)  ;;  %s4838_s21 = smov (!%p328_p9), 32   ;;  %s4847_s0 = sld [smem:[#allocation5_spill]] (!%p328_p9)  ;;  %v621_v36 = vld [vmem:[%s4829_s4] sm:$0xff] (!%p328_p9)  ;;  %vm769_vm2 = vcmask (!%p328_p9), 1046528  }
  0x13   : > { %2727 = vmatprep.subr.bf16.mxu1 (!%p328_p9), %v2726_v3  ;;  %v2738_v15 = vpack.c.bf16 (!%p328_p9), %v443_v12, %v442_v9  ;;  %v622_v37 = vld [vmem:[%s4829_s4 + $0x8] sm:$0xff] (!%p328_p9)  ;;  %v623_v38 = vld [vmem:[%s4829_s4 + $0x10] sm:$0xff] (!%p328_p9)  ;;  %v624_v40 = vld [vmem:[%s4829_s4 + $0x18] sm:$0xff] (!%p328_p9)  ;;  %vm1018_vm3 = vcmask (!%p328_p9), 1041408   ;;  %vm973_vm4 = vcmask (!%p328_p9), 1042432   ;;  %vm854_vm5 = vcmask (!%p328_p9), 1045504  }
  0x14   : > { %2729 = vmatpush3.bf16.msra.mxu1 (!%p328_p9), %v2726_v3  ;;  %v2742_v39 = vpack.c.bf16 (!%p328_p9), %v622_v37, %v621_v36  ;;  %v2746_v41 = vpack.c.bf16 (!%p328_p9), %v624_v40, %v623_v38  ;;  %v2493_v42 = vld [vmem:[%s4828_s3] ss:$0 sm:$0xff] (!%p328_p9)  ;;  %v1305_v12 = vld [vmem:[%s4831_s6 + $0x108] sm:$0xff] (!%p328_p9)  ;;  %v1275_v36 = vld [vmem:[%s4831_s6 + $0x18] sm:$0xff] (!%p328_p9)  ;;  %s4840_s18 = smov (!%p328_p9), 64   ;;  %s4848_s20 = smov (!%p328_p9), 32  }
  0x15   : > { %2731 = vmatprep.subr.bf16.mxu1 (!%p328_p9), %v2730_v5  ;;  %v1292_v38 = vld [vmem:[%s4831_s6 + $0xa0] sm:$0xff] (!%p328_p9)  ;;  %vm899_vm6 = vcmask (!%p328_p9), 1044480   ;;  %vm1063_vm7 = vcmask (!%p328_p9), 1040384   ;;  %vm944_vm8 = vcmask (!%p328_p9), 1043456   ;;  %vm1219_vm9 = vcmask (!%p328_p9), 785408  }
  0x18   : > { %s4856_s25 = smov (!%p371_p10, %s2485_s25), 7  ;;  %2733 = vmatpush3.bf16.msra.mxu1 %v2730_v5 }
  0x19   : > { %s380_s30 = scalar_lea.vmem %s4846_s1, %s4856_s25  ;;  %2735 = vmatprep.subr.bf16.mxu1 %v2734_v8  ;;  %s2535_s26 = sshll.u32 %s4856_s25, 4 }
  0x1a   : > { %v2489_v10 = vld [vmem:[%s380_s30] ss:$0 sm:$0xff]  ;;  %v2491_v11 = vld [vmem:[%s380_s30 + $0x2] ss:$0 sm:$0xff]  ;;  %v2490_v13 = vld [vmem:[%s380_s30 + $0x1] ss:$0 sm:$0xff]  ;;  %s375_s29 = scalar_lea.vmem %s4847_s0, %s2535_s26 }
  0x1b   : > { %415 = vrot.lane.b32.xlu0 %v2489_v10, %s4838_s21  ;;  %419 = vrot.lane.b32.xlu1 %v2491_v11, %s4838_s21  ;;  %v2492_v14 = vld [vmem:[%s380_s30 + $0x3] ss:$0 sm:$0xff]  ;;  %v384_v17 = vld [vmem:[%s375_s29 + $0x8] sm:$0xff]  ;;  %s4836_s25 = smov 96   ;;  %s4849_s26 = smov 96  }
  0x1c   : > { %2737 = vmatpush3.bf16.msra.mxu1 %v2734_v8  ;;  %v383_v16 = vld [vmem:[%s375_s29] sm:$0xff]  ;;  %v385_v22 = vld [vmem:[%s375_s29 + $0x10] sm:$0xff]  ;;  %v386_v23 = vld [vmem:[%s375_s29 + $0x18] sm:$0xff] }
  0x1d   : > { %2739 = vmatprep.subr.bf16.mxu1 %v2738_v15  ;;  %v387_v24 = vld [vmem:[%s375_s29 + $0x20] sm:$0xff]  ;;  %v388_v29 = vld [vmem:[%s375_s29 + $0x28] sm:$0xff]  ;;  %v389_v31 = vld [vmem:[%s375_s29 + $0x30] sm:$0xff] }
  0x1e   : > { %v390_v33 = vld [vmem:[%s375_s29 + $0x38] sm:$0xff]  ;;  %v1304_v11 = vld [vmem:[%s4831_s6 + $0x100] sm:$0xff]  ;;  %s4850_s29 = smov 64  }
  0x1f   : > { %417 = vrot.lane.b32.xlu0 %v2490_v13, %s4838_s21  ;;  %421 = vrot.lane.b32.xlu1 %v2492_v14, %s4838_s21  ;;  %v3250_v13 = vmov 0.0|0.0   ;;  %v2783_v14 = vpack.c.bf16 %v1305_v12, %v1304_v11  ;;  %v1322_v11 = vld [vmem:[%s4831_s6 + $0x190] sm:$0xff]  ;;  %v1323_v12 = vld [vmem:[%s4831_s6 + $0x198] sm:$0xff]  ;;  %s3253_s21 = smov [#allocation2]  }
  0x20   : > { %2741 = vmatpush3.bf16.msra.mxu1 %v2738_v15  ;;  %2782 = vmatprep.subr.bf16.mxu0 %v3250_v13  ;;  %v1306_v15 = vld [vmem:[%s4831_s6 + $0x110] sm:$0xff]  ;;  %s3188_s28 = sshll.u32 %s3253_s21, 4  ;;  %s3189_s28 = int_to_ptr.vmem [resolvable:$false] %s3188_s28 }
  0x21   : > { %2743 = vmatprep.subr.bf16.mxu1 %v2742_v39  ;;  %2784 = vmatpush1.bf16.msra.mxu0 %v2783_v14 }
  0x22   : > { %2785 = vmatprep.subr.bf16.mxu0 %v3250_v13 }
  0x8d   : > { %v416_v18 = vpop.permute.xlu0 %415  ;;  %v420_v19 = vpop.permute.xlu1 %419 }
  0x8e   : > { %v428_v20 = vsel %vm427_vm0, %v383_v16, %v416_v18  ;;  %v429_v21 = vsel %vm427_vm0, %v384_v17, %v416_v18  ;;  %v432_v28 = vsel %vm427_vm0, %v387_v24, %v420_v19  ;;  %v433_v32 = vsel %vm427_vm0, %v388_v29, %v420_v19  ;;  %v1307_v16 = vld [vmem:[%s4831_s6 + $0x118] sm:$0xff]  ;;  %v1308_v18 = vld [vmem:[%s4831_s6 + $0x120] sm:$0xff]  ;;  %v1309_v19 = vld [vmem:[%s4831_s6 + $0x128] sm:$0xff] }
  0x8f   : > { %2694 = vmatprep.mubr.msk.f32.mxu1 %vm451_vm1, %v428_v20  ;;  %v2786_v17 = vpack.c.bf16 %v1307_v16, %v1306_v15  ;;  %v1310_v20 = vld [vmem:[%s4831_s6 + $0x130] sm:$0xff]  ;;  %v1289_v24 = vld [vmem:[%s4831_s6 + $0x88] sm:$0xff]  ;;  %v2810_v16 = vpack.c.bf16 %v1323_v12, %v1322_v11 }
  0x90   : > { %2695 = vmatmul.mubr.msk.f32.vlgmr.msra.gmra.mrb[0].mxu1 %vm451_vm1, %v429_v21  ;;  %v2789_v21 = vpack.c.bf16 %v1309_v19, %v1308_v18 }
  0x91   : > { %v418_v25 = vpop.permute.xlu0 %417  ;;  %v422_v30 = vpop.permute.xlu1 %421  ;;  %2745 = vmatpush3.bf16.msra.mxu1 %v2742_v39  ;;  %2787 = vmatpush1.bf16.msra.mxu0 %v2786_v17  ;;  %v1293_v39 = vld [vmem:[%s4831_s6 + $0xa8] sm:$0xff] }
  0x92   : > { %v430_v26 = vsel %vm427_vm0, %v385_v22, %v418_v25  ;;  %v431_v27 = vsel %vm427_vm0, %v386_v23, %v418_v25  ;;  %v434_v34 = vsel %vm427_vm0, %v389_v31, %v422_v30  ;;  %v435_v35 = vsel %vm427_vm0, %v390_v33, %v422_v30  ;;  %2747 = vmatprep.subr.bf16.mxu1 %v2746_v41  ;;  %v1311_v22 = vld [vmem:[%s4831_s6 + $0x138] sm:$0xff]  ;;  %v1288_v23 = vld [vmem:[%s4831_s6 + $0x80] sm:$0xff]  ;;  %v1290_v31 = vld [vmem:[%s4831_s6 + $0x90] sm:$0xff] }
  0x93   : > { %2697 = vmatprep.mubr.msk.f32.mxu1 %vm451_vm1, %v430_v26  ;;  %2788 = vmatprep.subr.bf16.mxu0 %v3250_v13  ;;  %v2750_v25 = vpack.c.bf16 %v1289_v24, %v1288_v23  ;;  %v1272_v26 = vld [vmem:[%s4831_s6] sm:$0xff]  ;;  %v1313_v33 = vld [vmem:[%s4831_s6 + $0x148] sm:$0xff]  ;;  %v2758_v40 = vpack.c.bf16 %v1293_v39, %v1292_v38  ;;  %v3251_v23 = vmov 0.0  }
  0x94   : > { %2698 = vmatmul.mubr.msk.f32.gmra.mrb[2].mxu1 %vm451_vm1, %v431_v27  ;;  %v1273_v27 = vld [vmem:[%s4831_s6 + $0x8] sm:$0xff]  ;;  %v1312_v30 = vld [vmem:[%s4831_s6 + $0x140] sm:$0xff]  ;;  %v3598_v24 = vrot.slane %v3251_v23, 6 }
  0x95   : > { %2700 = vmatprep.mubr.msk.f32.mxu1 %vm451_vm1, %v432_v28  ;;  %2749 = vmatpush3.bf16.msra.mxu1 %v2746_v41  ;;  %v2792_v28 = vpack.c.bf16 %v1311_v22, %v1310_v20  ;;  %v2752_v29 = vpack.c.bf16 %v1273_v27, %v1272_v26  ;;  %v1276_v41 = vld [vmem:[%s4831_s6 + $0x20] sm:$0xff] }
  0x96   : > { %2790 = vmatpush1.bf16.msra.mxu0 %v2789_v21  ;;  %2751 = vmatprep.subr.bf16.mxu1 %v2750_v25 }
  0x97   : > { %2791 = vmatprep.subr.bf16.mxu0 %v3250_v13 }
  0x98   : > { %2701 = vmatmul.mubr.msk.f32.gmra.mrb[4].mxu1 %vm451_vm1, %v433_v32  ;;  %v1291_v32 = vld [vmem:[%s4831_s6 + $0x98] sm:$0xff] }
  0x99   : > { %2703 = vmatprep.mubr.msk.f32.mxu1 %vm451_vm1, %v434_v34  ;;  %v2754_v34 = vpack.c.bf16 %v1291_v32, %v1290_v31 }
  0x9a   : > { %2793 = vmatpush1.bf16.msra.mxu0 %v2792_v28  ;;  %v3607_v28 = vrot.slane %v3251_v23, 5 }
  0x9b   : > { %2794 = vmatprep.subr.bf16.mxu0 %v3250_v13 }
  0x9c   : > { %2704 = vmatmul.mubr.msk.f32.gmra.mrb[6].mxu1 %vm451_vm1, %v435_v35  ;;  %v1274_v35 = vld [vmem:[%s4831_s6 + $0x10] sm:$0xff] }
  0x9d   : > { %v2756_v37 = vpack.c.bf16 %v1275_v36, %v1274_v35 }
 0x163   : > { %v2696_v43 = vpop.f32.mrb[0].mxu1 }
 0x164   : > { %v548_v44 = vadd.f32 %v2696_v43, %v2493_v42  ;;  %v542_v45 = vpop.f32.mrb[1].mxu1  ;;  %v2795_v43 = vpack.c.bf16 %v1313_v33, %v1312_v30 }
 0x165   : > { %v543_v46 = vadd.f32 %v2493_v42, %v542_v45  ;;  %v1295_v45 = vld [vmem:[%s4831_s6 + $0xb8] sm:$0xff] }
 0x166   : > { %591 = vrot.lane.b32.xlu1 %v548_v44, %s4836_s25  ;;  %2796 = vmatpush1.bf16.msra.mxu0 %v2795_v43 }
 0x167   : > { %v2699_v47 = vpop.f32.mrb[2].mxu1  ;;  %589 = vrot.lane.b32.xlu0 %v543_v46, %s4836_s25  ;;  %2797 = vmatprep.subr.bf16.mxu0 %v3250_v13 }
 0x168   : > { %v558_v48 = vadd.f32 %v2699_v47, %v2493_v42  ;;  %v552_v49 = vpop.f32.mrb[3].mxu1  ;;  %v1315_v47 = vld [vmem:[%s4831_s6 + $0x158] sm:$0xff] }
 0x169   : > { %v553_v50 = vadd.f32 %v2493_v42, %v552_v49 }
 0x16a   : > { %595 = vrot.lane.b32.xlu1 %v558_v48, %s4836_s25 }
 0x16b   : > { %v2702_v51 = vpop.f32.mrb[4].mxu1  ;;  %593 = vrot.lane.b32.xlu0 %v553_v50, %s4836_s25 }
 0x16c   : > { %v568_v52 = vadd.f32 %v2702_v51, %v2493_v42  ;;  %v562_v53 = vpop.f32.mrb[5].mxu1  ;;  %v1279_v51 = vld [vmem:[%s4831_s6 + $0x38] sm:$0xff] }
 0x16d   : > { %v563_v54 = vadd.f32 %v2493_v42, %v562_v53  ;;  %v1296_v53 = vld [vmem:[%s4831_s6 + $0xc0] sm:$0xff] }
 0x16e   : > { %599 = vrot.lane.b32.xlu1 %v568_v52, %s4836_s25 }
 0x16f   : > { %v2705_v55 = vpop.f32.mrb[6].mxu1  ;;  %597 = vrot.lane.b32.xlu0 %v563_v54, %s4836_s25 }
 0x170   : > { %v578_v56 = vadd.f32 %v2705_v55, %v2493_v42  ;;  %v572_v57 = vpop.f32.mrb[7].mxu1  ;;  %v1316_v55 = vld [vmem:[%s4831_s6 + $0x160] sm:$0xff] }
 0x171   : > { %v573_v58 = vadd.f32 %v2493_v42, %v572_v57  ;;  %v1277_v42 = vld [vmem:[%s4831_s6 + $0x28] sm:$0xff] }
 0x172   : > { %603 = vrot.lane.b32.xlu1 %v578_v56, %s4836_s25 }
 0x173   : > { %601 = vrot.lane.b32.xlu0 %v573_v58, %s4836_s25 }
 0x1d8   : > { %v592_v59 = vpop.permute.xlu1 %591 }
 0x1d9   : > { %v590_v60 = vpop.permute.xlu0 %589  ;;  %v614_v62 = vmul.f32 %v592_v59, %v548_v44  ;;  %v1294_v44 = vld [vmem:[%s4831_s6 + $0xb0] sm:$0xff]  ;;  %v1280_v59 = vld [vmem:[%s4831_s6 + $0x40] sm:$0xff] }
 0x1da   : > { %v613_v61 = vmul.f32 %v590_v60, %v543_v46  ;;  %v1314_v46 = vld [vmem:[%s4831_s6 + $0x150] sm:$0xff]  ;;  %v2762_v49 = vpack.c.bf16 %v1295_v45, %v1294_v44  ;;  %v1281_v60 = vld [vmem:[%s4831_s6 + $0x48] sm:$0xff] }
 0x1dc   : > { %v596_v63 = vpop.permute.xlu1 %595  ;;  %2714 = vmatprep.mubr.msk.f32.mxu1 %vm427_vm0, %v613_v61 }
 0x1dd   : > { %2715 = vmatmul.mubr.msk.f32.vlgmr.msra.gmra.mrb[8].mxu1 %vm427_vm0, %v614_v62  ;;  %v594_v0 = vpop.permute.xlu0 %593  ;;  %v616_v2 = vmul.f32 %v596_v63, %v558_v48  ;;  %v2760_v48 = vpack.c.bf16 %v1277_v42, %v1276_v41  ;;  %v1318_v62 = vld [vmem:[%s4831_s6 + $0x170] sm:$0xff]  ;;  %v1319_v63 = vld [vmem:[%s4831_s6 + $0x178] sm:$0xff] }
 0x1de   : > { %v615_v1 = vmul.f32 %v594_v0, %v553_v50  ;;  %2753 = vmatpush3.bf16.msra.mxu1 %v2752_v29  ;;  %v1278_v50 = vld [vmem:[%s4831_s6 + $0x30] sm:$0xff]  ;;  %v2768_v0 = vpack.c.bf16 %v1281_v60, %v1280_v59 }
 0x1df   : > { %2755 = vmatprep.subr.bf16.mxu1 %v2754_v34  ;;  %v2764_v57 = vpack.c.bf16 %v1279_v51, %v1278_v50 }
 0x1e0   : > { %v600_v3 = vpop.permute.xlu1 %599  ;;  %2717 = vmatprep.mubr.msk.f32.mxu1 %vm427_vm0, %v615_v1  ;;  %v2804_v1 = vpack.c.bf16 %v1319_v63, %v1318_v62 }
 0x1e1   : > { %2718 = vmatmul.mubr.msk.f32.gmra.mrb[10].mxu1 %vm427_vm0, %v616_v2  ;;  %v598_v4 = vpop.permute.xlu0 %597  ;;  %v618_v6 = vmul.f32 %v600_v3, %v568_v52  ;;  %v2798_v52 = vpack.c.bf16 %v1315_v47, %v1314_v46  ;;  %v1320_v2 = vld [vmem:[%s4831_s6 + $0x180] sm:$0xff]  ;;  %v1321_v3 = vld [vmem:[%s4831_s6 + $0x188] sm:$0xff] }
 0x1e2   : > { %v617_v5 = vmul.f32 %v598_v4, %v563_v54  ;;  %2757 = vmatpush3.bf16.msra.mxu1 %v2756_v37  ;;  %v1297_v54 = vld [vmem:[%s4831_s6 + $0xc8] sm:$0xff]  ;;  %v2807_v4 = vpack.c.bf16 %v1321_v3, %v1320_v2 }
 0x1e3   : > { %2759 = vmatprep.subr.bf16.mxu1 %v2758_v40  ;;  %2799 = vmatpush1.bf16.msra.mxu0 %v2798_v52 }
 0x1e4   : > { %v604_v7 = vpop.permute.xlu1 %603  ;;  %2720 = vmatprep.mubr.msk.f32.mxu1 %vm427_vm0, %v617_v5  ;;  %2800 = vmatprep.subr.bf16.mxu0 %v3250_v13  ;;  %v3567_v5 = vld [vmem:[%s4830_s5] ss:$0 sm:$0xff] }
 0x1e5   : > { %2721 = vmatmul.mubr.msk.f32.gmra.mrb[12].mxu1 %vm427_vm0, %v618_v6  ;;  %v602_v8 = vpop.permute.xlu0 %601  ;;  %v620_v10 = vmul.f32 %v604_v7, %v578_v56  ;;  %v1317_v56 = vld [vmem:[%s4831_s6 + $0x168] sm:$0xff]  ;;  %v1298_v6 = vld [vmem:[%s4831_s6 + $0xd0] sm:$0xff]  ;;  %v1299_v7 = vld [vmem:[%s4831_s6 + $0xd8] sm:$0xff] }
 0x1e6   : > { %v619_v9 = vmul.f32 %v602_v8, %v573_v58  ;;  %2761 = vmatpush3.bf16.msra.mxu1 %v2760_v48  ;;  %v2766_v58 = vpack.c.bf16 %v1297_v54, %v1296_v53  ;;  %v2801_v61 = vpack.c.bf16 %v1317_v56, %v1316_v55  ;;  %v1282_v8 = vld [vmem:[%s4831_s6 + $0x50] sm:$0xff] }
 0x1e7   : > { %2763 = vmatprep.subr.bf16.mxu1 %v2762_v49 }
 0x1e8   : > { %2723 = vmatprep.mubr.msk.f32.mxu1 %vm427_vm0, %v619_v9  ;;  %2802 = vmatpush1.bf16.msra.mxu0 %v2801_v61  ;;  %v2770_v9 = vpack.c.bf16 %v1299_v7, %v1298_v6 }
 0x1e9   : > { %2724 = vmatmul.mubr.msk.f32.gmra.mrb[14].mxu1 %vm427_vm0, %v620_v10  ;;  %2803 = vmatprep.subr.bf16.mxu0 %v3250_v13  ;;  %v1283_v10 = vld [vmem:[%s4831_s6 + $0x58] sm:$0xff] }
 0x1ea   : > { %2765 = vmatpush3.bf16.msra.mxu1 %v2764_v57  ;;  %v2772_v15 = vpack.c.bf16 %v1283_v10, %v1282_v8 }
 0x1eb   : > { %2767 = vmatprep.subr.bf16.mxu1 %v2766_v58 }
 0x1ec   : > { %2805 = vmatpush1.bf16.msra.mxu0 %v2804_v1 }
 0x1ed   : > { %2806 = vmatprep.subr.bf16.mxu0 %v3250_v13 }
 0x1ee   : > { %2769 = vmatpush3.bf16.msra.mxu1 %v2768_v0 }
 0x1ef   : > { %2771 = vmatprep.subr.bf16.mxu1 %v2770_v9 }
 0x1f0   : > { %2808 = vmatpush1.bf16.msra.mxu0 %v2807_v4 }
 0x1f1   : > { %2809 = vmatprep.subr.bf16.mxu0 %v3250_v13 }
 0x1f2   : > { %2773 = vmatpush3.bf16.msra.mxu1 %v2772_v15 }
 0x1f4   : > { %2811 = vmatpush1.bf16.msra.mxu0 %v2810_v16 }
 0x1f5   : > { %2812 = vmatprep.subr.bf16.mxu0 %v3250_v13 }
 0x2b0   : > { %v2716_v14 = vpop.f32.mrb[8].mxu1 }
 0x2b1   : > { %v3589_v17 = vadd.f32 %v2716_v14, %v3567_v5  ;;  %v722_v18 = vpop.f32.mrb[9].mxu1 }
 0x2b2   : > { %v3592_v19 = vadd.f32 %v3567_v5, %v722_v18 }
 0x2b3   : > { %v771_v20 = vrot.slane %v3589_v17, 1 }
 0x2b4   : > { %v770_v21 = vrot.slane %v3592_v19, 1  ;;  %v2719_v22 = vpop.f32.mrb[10].mxu1 }
 0x2b5   : > { %v3601_v25 = vsel %vm769_vm2, %v771_v20, 0.0  ;;  %v3604_v26 = vadd.f32 %v2719_v22, %v3567_v5  ;;  %v732_v27 = vpop.f32.mrb[11].mxu1 }
 0x2b6   : > { %v3610_v29 = vsel %vm769_vm2, %v770_v21, %v771_v20  ;;  %v3613_v30 = vsel %vm769_vm2, 0.0, %v770_v21  ;;  %v3616_v31 = vadd.f32 %v3567_v5, %v732_v27  ;;  %v1022_v32 = vrot.slane %v3601_v25, 6 }
 0x2b7   : > { %v977_v33 = vrot.slane %v3601_v25, 5  ;;  %v855_v34 = vrot.slane %v3613_v30, 2  ;;  %v856_v35 = vrot.slane %v3610_v29, 2  ;;  %v1019_v38 = vrot.slane %v3613_v30, 6 }
 0x2b8   : > { %v3622_v36 = vpop.f32.mrb[12].mxu1  ;;  %v1187_v37 = vsel %vm1018_vm3, %v1022_v32, %v3598_v24  ;;  %v1020_v39 = vrot.slane %v3610_v29, 6  ;;  %v774_v43 = vrot.slane %v3604_v26, 1  ;;  %v773_v44 = vrot.slane %v3616_v31, 1 }
 0x2b9   : > { %1191 = vrot.lane.b32.xlu0 %v1187_v37, %s4840_s18  ;;  %v1170_v40 = vsel %vm973_vm4, %v977_v33, %v3607_v28  ;;  %v3631_v41 = vpop.f32.mrb[13].mxu1  ;;  %v857_v42 = vsel %vm854_vm5, %v855_v34, %v856_v35  ;;  %v810_v47 = vrot.slane %v3613_v30, 1  ;;  %v811_v48 = vrot.slane %v3610_v29, 1 }
 0x2ba   : > { %1174 = vrot.lane.b32.xlu1 %v1170_v40, %s4848_s20  ;;  %v1021_v45 = vsel %vm1018_vm3, %v1019_v38, %v1020_v39  ;;  %v974_v50 = vrot.slane %v3613_v30, 5  ;;  %v975_v51 = vrot.slane %v3610_v29, 5  ;;  %v900_v52 = vrot.slane %v3613_v30, 3 }
 0x2bb   : > { %v2949_v46 = vpack.i.bf16 %v857_v42, %v1021_v45  ;;  %v812_v53 = vsel %vm769_vm2, %v810_v47, %v811_v48  ;;  %v901_v55 = vrot.slane %v3610_v29, 3  ;;  %v3652_v56 = vsel %vm769_vm2, %v773_v44, %v774_v43 }
 0x2bc   : > { %v3642_v49 = vpop.f32.mrb[14].mxu1  ;;  %v3655_v57 = vsel %vm769_vm2, 0.0, %v773_v44  ;;  %v976_v58 = vsel %vm973_vm4, %v974_v50, %v975_v51  ;;  %v1064_v61 = vrot.slane %v3613_v30, 7  ;;  %v1065_v62 = vrot.slane %v3610_v29, 7 }
 0x2bd   : > { %v3648_v54 = vpop.f32.mrb[15].mxu1  ;;  %v2944_v59 = vpack.i.bf16 %v812_v53, %v976_v58  ;;  %v902_v60 = vsel %vm899_vm6, %v900_v52, %v901_v55  ;;  %v978_v63 = vsel %vm973_vm4, %v975_v51, %v977_v33  ;;  %v979_v0 = vrot.slane %v3655_v57, 5 }
 0x2be   : > { %2950 = vrot.lane.b32.xlu1 %v2949_v46, %s4840_s18  ;;  %v980_v1 = vrot.slane %v3652_v56, 5  ;;  %v1066_v2 = vsel %vm1063_vm7, %v1064_v61, %v1065_v62  ;;  %v813_v3 = vrot.slane %v3601_v25, 1  ;;  %v903_v4 = vrot.slane %v3601_v25, 3 }
 0x2bf   : > { %2945 = vrot.lane.b32.xlu0 %v2944_v59, %s4848_s20  ;;  %v2954_v6 = vpack.i.bf16 %v902_v60, %v1066_v2  ;;  %v1067_v7 = vrot.slane %v3601_v25, 7  ;;  %v1024_v9 = vrot.slane %v3655_v57, 6  ;;  %v1023_v10 = vsel %vm1018_vm3, %v1020_v39, %v1022_v32 }
 0x2c0   : > { %v981_v8 = vsel %vm973_vm4, %v979_v0, %v980_v1  ;;  %v904_v11 = vsel %vm899_vm6, %v901_v55, %v903_v4  ;;  %v1025_v14 = vrot.slane %v3652_v56, 6  ;;  %v3681_v15 = vsel %vm769_vm2, %v774_v43, 0.0 }
 0x2c1   : > { %v1068_v12 = vsel %vm1063_vm7, %v1065_v62, %v1067_v7  ;;  %v814_v16 = vsel %vm769_vm2, %v811_v48, %v813_v3  ;;  %v858_v18 = vrot.slane %v3601_v25, 2  ;;  %v815_v27 = vrot.slane %v3655_v57, 1 }
 0x2c2   : > { %996 = vrot.lane.b32.xlu1 %v978_v63, %s4848_s20  ;;  %v2964_v20 = vpack.i.bf16 %v981_v8, %v814_v16  ;;  %v2959_v21 = vpack.i.bf16 %v904_v11, %v1068_v12  ;;  %v1026_v22 = vsel %vm1018_vm3, %v1024_v9, %v1025_v14  ;;  %v816_v32 = vrot.slane %v3652_v56, 1 }
 0x2c3   : > { %2955 = vrot.lane.b32.xlu0 %v2954_v6, %s4849_s26  ;;  %v982_v33 = vrot.slane %v3681_v15, 5  ;;  %v859_v34 = vsel %vm854_vm5, %v856_v35, %v858_v18  ;;  %v3698_v37 = vrot.slane %v3251_v23, 1  ;;  %v905_v39 = vrot.slane %v3655_v57, 3 }
 0x2c4   : > { %v2969_v38 = vpack.i.bf16 %v1026_v22, %v859_v34  ;;  %v817_v40 = vsel %vm769_vm2, %v815_v27, %v816_v32  ;;  %v906_v42 = vrot.slane %v3652_v56, 3  ;;  %v1069_v43 = vrot.slane %v3655_v57, 7 }
 0x2c5   : > { %v1070_v44 = vrot.slane %v3652_v56, 7  ;;  %v1171_v35 = vsel %vm973_vm4, %v982_v33, %v3607_v28  ;;  %v1027_v45 = vrot.slane %v3681_v15, 6  ;;  %v860_v46 = vrot.slane %v3655_v57, 2 }
 0x2c6   : > { %1041 = vrot.lane.b32.xlu1 %v1023_v10, %s4840_s18  ;;  %v861_v47 = vrot.slane %v3652_v56, 2  ;;  %v3715_v48 = vadd.f32 %v3622_v36, %v3567_v5  ;;  %v3719_v50 = vadd.f32 %v3567_v5, %v3631_v41  ;;  %v1110_v51 = vsel %vm769_vm2, %v813_v3, %v3698_v37 }
 0x2c7   : > { %2965 = vrot.lane.b32.xlu0 %v2964_v20, %s4848_s20  ;;  %v2974_v52 = vpack.i.bf16 %v1110_v51, %v817_v40  ;;  %v3725_v53 = vrot.slane %v3251_v23, 2  ;;  %v907_v55 = vsel %vm899_vm6, %v905_v39, %v906_v42  ;;  %v1071_v36 = vsel %vm1063_vm7, %v1069_v43, %v1070_v44 }
 0x2c8   : > { %v1072_v58 = vrot.slane %v3681_v15, 7  ;;  %v1188_v41 = vsel %vm1018_vm3, %v1027_v45, %v3598_v24  ;;  %v862_v59 = vsel %vm854_vm5, %v860_v46, %v861_v47  ;;  %v777_v60 = vrot.slane %v3715_v48, 1 }
 0x2c9   : > { %v776_v61 = vrot.slane %v3719_v50, 1  ;;  %v3742_v62 = vrot.slane %v3251_v23, 3  ;;  %v2984_v63 = vpack.i.bf16 %v907_v55, %v1071_v36  ;;  %v1127_v0 = vsel %vm854_vm5, %v858_v18, %v3725_v53  ;;  %v1301_v36 = vld [vmem:[%s4831_s6 + $0xe8] sm:$0xff] }
 0x2ca   : > { %2960 = vrot.lane.b32.xlu1 %v2959_v21, %s4849_s26  ;;  %v2979_v2 = vpack.i.bf16 %v1127_v0, %v862_v59  ;;  %v1073_v3 = vsel %vm1063_vm7, %v1070_v44, %v1072_v58  ;;  %v3749_v6 = vsel %vm769_vm2, %v777_v60, 0.0  ;;  %v983_v11 = vsel %vm973_vm4, %v980_v1, %v982_v33  ;;  %v1284_v59 = vld [vmem:[%s4831_s6 + $0x60] sm:$0xff] }
 0x2cb   : > { %2970 = vrot.lane.b32.xlu0 %v2969_v38, %s4840_s18  ;;  %v3752_v7 = vsel %vm769_vm2, %v776_v61, %v777_v60  ;;  %v3755_v8 = vsel %vm769_vm2, 0.0, %v776_v61  ;;  %v1144_v9 = vsel %vm899_vm6, %v903_v4, %v3742_v62  ;;  %v1032_v12 = vrot.slane %v3749_v6, 6  ;;  %v1324_v0 = vld [vmem:[%s4831_s6 + $0x1a0] sm:$0xff] }
 0x2cc   : > { %v2989_v10 = vpack.i.bf16 %v1073_v3, %v1144_v9  ;;  %v984_v16 = vrot.slane %v3755_v8, 5  ;;  %v985_v18 = vrot.slane %v3752_v7, 5  ;;  %v3769_v20 = vadd.f32 %v3642_v49, %v3567_v5 }
 0x2cd   : > { %v3773_v4 = vadd.f32 %v3567_v5, %v3648_v54  ;;  %v1074_v21 = vrot.slane %v3755_v8, 7  ;;  %v1075_v1 = vrot.slane %v3752_v7, 7  ;;  %v818_v22 = vrot.slane %v3681_v15, 1 }
 0x2ce   : > { %1176 = vrot.lane.b32.xlu1 %v1171_v35, %s4848_s20  ;;  %v1028_v27 = vsel %vm1018_vm3, %v1025_v14, %v1027_v45  ;;  %v987_v33 = vrot.slane %v3749_v6, 5  ;;  %v908_v49 = vrot.slane %v3681_v15, 3  ;;  %v1189_v5 = vsel %vm1018_vm3, %v1032_v12, %v3598_v24 }
 0x2cf   : > { %2975 = vrot.lane.b32.xlu0 %v2974_v52, %s4848_s20  ;;  %v986_v54 = vsel %vm973_vm4, %v984_v16, %v985_v18  ;;  %v1029_v34 = vrot.slane %v3755_v8, 6  ;;  %v1030_v38 = vrot.slane %v3752_v7, 6  ;;  %v780_v14 = vrot.slane %v3769_v20, 1  ;;  %v1302_v16 = vld [vmem:[%s4831_s6 + $0xf0] sm:$0xff] }
 0x2d0   : > { %v779_v39 = vrot.slane %v3773_v4, 1  ;;  %v1076_v40 = vsel %vm1063_vm7, %v1074_v21, %v1075_v1  ;;  %v819_v43 = vsel %vm769_vm2, %v816_v32, %v818_v22  ;;  %v863_v44 = vrot.slane %v3681_v15, 2  ;;  %v1300_v32 = vld [vmem:[%s4831_s6 + $0xe0] sm:$0xff]  ;;  %v1303_v21 = vld [vmem:[%s4831_s6 + $0xf8] sm:$0xff] }
 0x2d1   : > { %v865_v35 = vrot.slane %v3755_v8, 2  ;;  %v866_v45 = vrot.slane %v3752_v7, 2  ;;  %v1172_v46 = vsel %vm973_vm4, %v987_v33, %v3607_v28  ;;  %v2994_v51 = vpack.i.bf16 %v986_v54, %v819_v43  ;;  %v1327_v43 = vld [vmem:[%s4831_s6 + $0x1b8] sm:$0xff] }
 0x2d2   : > { %1193 = vrot.lane.b32.xlu1 %v1188_v41, %s4840_s18  ;;  %v820_v52 = vrot.slane %v3755_v8, 1  ;;  %v821_v55 = vrot.slane %v3752_v7, 1  ;;  %v909_v58 = vsel %vm899_vm6, %v906_v42, %v908_v49  ;;  %v1031_v41 = vsel %vm1018_vm3, %v1029_v34, %v1030_v38  ;;  %v1285_v42 = vld [vmem:[%s4831_s6 + $0x68] sm:$0xff] }
 0x2d3   : > { %2985 = vrot.lane.b32.xlu0 %v2984_v63, %s4849_s26  ;;  %v3833_v60 = vsel %vm769_vm2, %v779_v39, %v780_v14  ;;  %v3836_v61 = vsel %vm769_vm2, 0.0, %v779_v39  ;;  %v3004_v63 = vpack.i.bf16 %v1076_v40, %v909_v58  ;;  %v864_v3 = vsel %vm854_vm5, %v861_v47, %v863_v44  ;;  %v1286_v47 = vld [vmem:[%s4831_s6 + $0x70] sm:$0xff]  ;;  %v1287_v39 = vld [vmem:[%s4831_s6 + $0x78] sm:$0xff] }
 0x2d4   : > { %v867_v9 = vsel %vm854_vm5, %v865_v35, %v866_v45  ;;  %v911_v54 = vrot.slane %v3752_v7, 3  ;;  %v822_v34 = vsel %vm769_vm2, %v820_v52, %v821_v55  ;;  %v1326_v40 = vld [vmem:[%s4831_s6 + $0x1b0] sm:$0xff]  ;;  %v990_v35 = vrot.slane %v3833_v60, 5 }
 0x2d5   : > { %v823_v58 = vrot.slane %v3749_v6, 1 }
 0x2d6   : > { %2980 = vrot.lane.b32.xlu1 %v2979_v2, %s4840_s18  ;;  %v1325_v2 = vld [vmem:[%s4831_s6 + $0x1a8] sm:$0xff] }
 0x2d7   : > { %2990 = vrot.lane.b32.xlu0 %v2989_v10, %s4849_s26  ;;  %v1128_v10 = vsel %vm854_vm5, %v863_v44, %v3725_v53  ;;  %v989_v44 = vrot.slane %v3836_v61, 5 }
 0x2d8   : > { %v3014_v52 = vpack.i.bf16 %v1128_v10, %v867_v9  ;;  %v1145_v9 = vsel %vm899_vm6, %v908_v49, %v3742_v62  ;;  %v1330_v49 = vld [vmem:[%s4831_s6 + $0x1d0] sm:$0xff] }
 0x2da   : > { %1000 = vrot.lane.b32.xlu1 %v983_v11, %s4848_s20  ;;  %v2774_v11 = vpack.c.bf16 %v1301_v36, %v1300_v32  ;;  %v2778_v32 = vpack.c.bf16 %v1303_v21, %v1302_v16  ;;  %v1111_v36 = vsel %vm769_vm2, %v818_v22, %v3698_v37  ;;  %v1329_v22 = vld [vmem:[%s4831_s6 + $0x1c8] sm:$0xff]  ;;  %v824_v16 = vsel %vm769_vm2, %v821_v55, %v823_v58  ;;  %v1331_v55 = vld [vmem:[%s4831_s6 + $0x1d8] sm:$0xff] }
 0x2db   : > { %1045 = vrot.lane.b32.xlu0 %v1028_v27, %s4840_s18  ;;  %v2999_v27 = vpack.i.bf16 %v1031_v41, %v864_v3  ;;  %v2780_v41 = vpack.c.bf16 %v1287_v39, %v1286_v47  ;;  %v868_v21 = vrot.slane %v3749_v6, 2 }
 0x2dc   : > { %2775 = vmatprep.subr.bf16.mxu1 %v2774_v11  ;;  %v3009_v11 = vpack.i.bf16 %v1111_v36, %v822_v34  ;;  %v826_v34 = vrot.slane %v3833_v60, 1  ;;  %v916_v36 = vrot.slane %v3833_v60, 3 }
 0x2de   : > { %1195 = vrot.lane.b32.xlu1 %v1189_v5, %s4840_s18  ;;  %v910_v5 = vrot.slane %v3755_v8, 3 }
 0x2df   : > { %1178 = vrot.lane.b32.xlu0 %v1172_v46, %s4848_s20  ;;  %v2776_v46 = vpack.c.bf16 %v1285_v42, %v1284_v59  ;;  %v1328_v59 = vld [vmem:[%s4831_s6 + $0x1c0] sm:$0xff]  ;;  %v991_v42 = vsel %vm973_vm4, %v989_v44, %v990_v35  ;;  %v2822_v44 = vpack.c.bf16 %v1331_v55, %v1330_v49 }
 0x2e0   : > { %v912_v3 = vsel %vm899_vm6, %v910_v5, %v911_v54  ;;  %v2819_v47 = vpack.c.bf16 %v1329_v22, %v1328_v59  ;;  %v825_v5 = vrot.slane %v3836_v61, 1  ;;  %v870_v22 = vrot.slane %v3836_v61, 2 }
 0x2e1   : > { %2777 = vmatpush3.bf16.msra.mxu1 %v2776_v46  ;;  %v3019_v10 = vpack.i.bf16 %v1145_v9, %v912_v3  ;;  %v988_v46 = vsel %vm973_vm4, %v985_v18, %v987_v33  ;;  %v3941_v18 = vsel %vm769_vm2, %v780_v14, 0.0  ;;  %v1033_v33 = vsel %vm1018_vm3, %v1030_v38, %v1032_v12 }
 0x2e2   : > { %2995 = vrot.lane.b32.xlu1 %v2994_v51, %s4848_s20  ;;  %v2813_v51 = vpack.c.bf16 %v1325_v2, %v1324_v0  ;;  %2779 = vmatprep.subr.bf16.mxu1 %v2778_v32  ;;  %v1034_v0 = vrot.slane %v3836_v61, 6  ;;  %v1035_v2 = vrot.slane %v3833_v60, 6  ;;  %v827_v32 = vsel %vm769_vm2, %v825_v5, %v826_v34 }
 0x2e3   : > { %3005 = vrot.lane.b32.xlu0 %v3004_v63, %s4849_s26  ;;  %v2816_v63 = vpack.c.bf16 %v1327_v43, %v1326_v40  ;;  %v869_v40 = vsel %vm854_vm5, %v866_v45, %v868_v21  ;;  %v913_v43 = vrot.slane %v3749_v6, 3  ;;  %v915_v45 = vrot.slane %v3836_v61, 3 }
 0x2e4   : > { %2814 = vmatpush1.bf16.msra.mxu0 %v2813_v51  ;;  %v1036_v39 = vsel %vm1018_vm3, %v1034_v0, %v1035_v2  ;;  %v828_v49 = vrot.slane %v3941_v18, 1  ;;  %v1037_v55 = vrot.slane %v3941_v18, 6 }
 0x2e5   : > { %2815 = vmatprep.subr.bf16.mxu0 %v3250_v13  ;;  %2781 = vmatpush3.bf16.msra.mxu1 %v2780_v41  ;;  %v3034_v51 = vpack.i.bf16 %v1036_v39, %v869_v40  ;;  %v1079_v41 = vrot.slane %v3836_v61, 7  ;;  %v914_v3 = vsel %vm899_vm6, %v911_v54, %v913_v43  ;;  %v917_v12 = vsel %vm899_vm6, %v915_v45, %v916_v36 }
 0x2e6   : > { %3000 = vrot.lane.b32.xlu1 %v2999_v27, %s4840_s18  ;;  %v3029_v27 = vpack.i.bf16 %v991_v42, %v824_v16  ;;  %v871_v42 = vrot.slane %v3833_v60, 2  ;;  %v1082_v54 = vrot.slane %v3941_v18, 7  ;;  %v829_v39 = vsel %vm769_vm2, %v826_v34, %v828_v49 }
 0x2e7   : > { %3015 = vrot.lane.b32.xlu0 %v3014_v52, %s4840_s18  ;;  %v1077_v52 = vrot.slane %v3749_v6, 7  ;;  %v1113_v40 = vsel %vm769_vm2, %v828_v49, %v3698_v37  ;;  %v1190_v45 = vsel %vm1018_vm3, %v1037_v55, %v3598_v24 }
 0x2e8   : > { %2817 = vmatpush1.bf16.msra.mxu0 %v2816_v63  ;;  %v1080_v63 = vrot.slane %v3833_v60, 7 }
 0x2e9   : > { %2818 = vmatprep.subr.bf16.mxu0 %v3250_v13  ;;  %v1078_v14 = vsel %vm1063_vm7, %v1075_v1, %v1077_v52  ;;  %v872_v1 = vsel %vm854_vm5, %v870_v22, %v871_v42 }
 0x2ea   : > { %3010 = vrot.lane.b32.xlu1 %v3009_v11, %s4848_s20  ;;  %v1112_v11 = vsel %vm769_vm2, %v823_v58, %v3698_v37  ;;  %v1081_v38 = vsel %vm1063_vm7, %v1079_v41, %v1080_v63  ;;  %v3024_v58 = vpack.i.bf16 %v914_v3, %v1078_v14  ;;  %v1083_v9 = vsel %vm1063_vm7, %v1080_v63, %v1082_v54 }
 0x2eb   : > { %3020 = vrot.lane.b32.xlu0 %v3019_v10, %s4849_s26  ;;  %v3039_v59 = vpack.i.bf16 %v1112_v11, %v827_v32  ;;  %v3049_v0 = vpack.i.bf16 %v917_v12, %v1081_v38  ;;  %v1129_v10 = vsel %vm854_vm5, %v868_v21, %v3725_v53  ;;  %v945_v3 = vrot.slane %v3613_v30, 4 }
 0x2ec   : > { %2820 = vmatpush1.bf16.msra.mxu0 %v2819_v47  ;;  %v3044_v16 = vpack.i.bf16 %v1129_v10, %v872_v1  ;;  %v1146_v47 = vsel %vm899_vm6, %v913_v43, %v3742_v62  ;;  %v1038_v43 = vsel %vm1018_vm3, %v1035_v2, %v1037_v55  ;;  %v948_v11 = vrot.slane %v3601_v25, 4 }
 0x2ed   : > { %2821 = vmatprep.subr.bf16.mxu0 %v3250_v13  ;;  %v3054_v5 = vpack.i.bf16 %v1083_v9, %v1146_v47 }
 0x2ee   : > { %3030 = vrot.lane.b32.xlu1 %v3029_v27, %s4848_s20  ;;  %v992_v27 = vrot.slane %v3941_v18, 5 }
 0x2ef   : > { %1004 = vrot.lane.b32.xlu0 %v988_v46, %s4848_s20  ;;  %v3059_v46 = vpack.i.bf16 %v1113_v40, %v829_v39  ;;  %v4024_v40 = vrot.slane %v3251_v23, 4 }
 0x2f0   : > { %2823 = vmatpush1.bf16.msra.mxu0 %v2822_v44  ;;  %v993_v21 = vsel %vm973_vm4, %v990_v35, %v992_v27  ;;  %v918_v44 = vrot.slane %v3941_v18, 3  ;;  %v1173_v52 = vsel %vm973_vm4, %v992_v27, %v3607_v28 }
 0x2f1   : > { %2856 = vmatprep.subr.bf16.mxu0 %v3250_v13 }
 0x2f2   : > { %3035 = vrot.lane.b32.xlu1 %v3034_v51, %s4840_s18  ;;  %v873_v51 = vrot.slane %v3941_v18, 2  ;;  %v919_v35 = vsel %vm899_vm6, %v916_v36, %v918_v44  ;;  %v1147_v32 = vsel %vm899_vm6, %v918_v44, %v3742_v62 }
 0x2f3   : > { %1049 = vrot.lane.b32.xlu0 %v1033_v33, %s4840_s18  ;;  %v946_v33 = vrot.slane %v3610_v29, 4 }
 0x2f4   : > { %v874_v34 = vsel %vm854_vm5, %v871_v42, %v873_v51  ;;  %v1130_v2 = vsel %vm854_vm5, %v873_v51, %v3725_v53 }
 0x2f5   : > { %v947_v54 = vsel %vm944_vm8, %v945_v3, %v946_v33 }
 0x2f6   : > { %3040 = vrot.lane.b32.xlu1 %v3039_v59, %s4848_s20 }
 0x2f7   : > { %3025 = vrot.lane.b32.xlu0 %v3024_v58, %s4849_s26 }
 0x2fa   : > { %3050 = vrot.lane.b32.xlu1 %v3049_v0, %s4849_s26  ;;  %v949_v0 = vsel %vm944_vm8, %v946_v33, %v948_v11 }
 0x2fb   : > { %3045 = vrot.lane.b32.xlu0 %v3044_v16, %s4840_s18 }
 0x2fe   : > { %3055 = vrot.lane.b32.xlu1 %v3054_v5, %s4849_s26 }
 0x2ff   : > { %1008 = vrot.lane.b32.xlu0 %v993_v21, %s4848_s20 }
 0x302   : > { %1053 = vrot.lane.b32.xlu1 %v1038_v43, %s4840_s18 }
 0x303   : > { %3060 = vrot.lane.b32.xlu0 %v3059_v46, %s4848_s20 }
 0x306   : > { %934 = vrot.lane.b32.xlu1 %v919_v35, %s4849_s26 }
 0x307   : > { %889 = vrot.lane.b32.xlu0 %v874_v34, %s4840_s18 }
 0x30a   : > { %1137 = vrot.lane.b32.xlu1 %v1130_v2, %s4840_s18  ;;  %v1161_v2 = vsel %vm944_vm8, %v948_v11, %v4024_v40 }
 0x30b   : > { %1180 = vrot.lane.b32.xlu0 %v1173_v52, %s4848_s20 }
 0x30e   : > { %1154 = vrot.lane.b32.xlu1 %v1147_v32, %s4849_s26 }
 0x30f   : > { %1197 = vrot.lane.b32.xlu0 %v1190_v45, %s4840_s18  ;;  %s2537_s18 = sshll.u32 %s3332_s17, 10 }
 0x310   : > { %s4775_s27 = scalar_lea.hbm %s4835_s10, %s2537_s18 }
 0x32b   : > { %v1192_v41 = vpop.permute.xlu0 %1191 }
 0x32c   : > { %v1175_v36 = vpop.permute.xlu1 %1174 }
 0x32d   : > { %v1264_v45 = vsel %vm427_vm0, %v1161_v2, %v1175_v36 }
 0x32e   : > { %v1268_v11 = vsel %vm451_vm1, %v1264_v45, %v1192_v41 }
 0x330   : > { %v2951_v63 = vpop.permute.xlu1 %2950 }
 0x331   : > { %v2946_v14 = vpop.permute.xlu0 %2945  ;;  %v2953_v12 = vunpack.i.h.bf16 %v2951_v63  ;;  %v2952_v38 = vunpack.i.l.bf16 %v2951_v63 }
 0x332   : > { %v2948_v59 = vunpack.i.h.bf16 %v2946_v14  ;;  %v2947_v22 = vunpack.i.l.bf16 %v2946_v14  ;;  %v950_v14 = vrot.slane %v3655_v57, 4 }
 0x334   : > { %v997_v42 = vpop.permute.xlu1 %996  ;;  %v1203_v58 = vsel %vm427_vm0, %v3613_v30, %v2948_v59  ;;  %v1228_v1 = vsel %vm427_vm0, %v947_v54, %v2947_v22  ;;  %v951_v59 = vrot.slane %v3652_v56, 4 }
 0x335   : > { %v2956_v9 = vpop.permute.xlu0 %2955  ;;  %v1229_v10 = vsel %vm427_vm0, %v949_v0, %v997_v42  ;;  %v1236_v5 = vsel %vm451_vm1, %v1228_v1, %v2952_v38  ;;  %v1211_v49 = vsel %vm451_vm1, %v1203_v58, %v2953_v12  ;;  %v953_v58 = vrot.slane %v3681_v15, 4 }
 0x336   : > { %v2958_v16 = vunpack.i.h.bf16 %v2956_v9  ;;  %v2957_v47 = vunpack.i.l.bf16 %v2956_v9  ;;  %v952_v54 = vsel %vm944_vm8, %v950_v14, %v951_v59 }
 0x338   : > { %v1042_v27 = vpop.permute.xlu1 %1041  ;;  %v1244_v21 = vsel %vm1219_vm9, %v1236_v5, %v2957_v47  ;;  %v1220_v30 = vsel %vm1219_vm9, %v1211_v49, %v2958_v16 }
 0x339   : > { %v1237_v55 = vsel %vm451_vm1, %v1229_v10, %v1042_v27  ;;  %v2966_v39 = vpop.permute.xlu0 %2965  ;;  %1427 = vmatprep.mubr.f32.mxu1 %v1244_v21 }
 0x33a   : > { %2512 = vmatprep.mubr.msk.f32.mxu0 %vm1219_vm9, %v1237_v55  ;;  %1428 = vmatmul.mubr.f32.vlgmr.msra.gmra.mrb[16].mxu1 %v1220_v30  ;;  %v2967_v44 = vunpack.i.l.bf16 %v2966_v39  ;;  %v2968_v22 = vunpack.i.h.bf16 %v2966_v39 }
 0x33c   : > { %v2961_v43 = vpop.permute.xlu1 %2960  ;;  %v1204_v23 = vsel %vm427_vm0, %v3610_v29, %v2967_v44  ;;  %v1230_v9 = vsel %vm427_vm0, %v952_v54, %v2968_v22 }
 0x33d   : > { %v2962_v46 = vunpack.i.l.bf16 %v2961_v43  ;;  %v2963_v51 = vunpack.i.h.bf16 %v2961_v43  ;;  %v2971_v35 = vpop.permute.xlu0 %2970  ;;  %v954_v43 = vsel %vm944_vm8, %v951_v59, %v953_v58 }
 0x33e   : > { %v2972_v52 = vunpack.i.l.bf16 %v2971_v35  ;;  %v2973_v12 = vunpack.i.h.bf16 %v2971_v35 }
 0x33f   : > { %v1245_v34 = vsel %vm1219_vm9, %v1237_v55, %v2962_v46 }
 0x340   : > { %v4029_v32 = vpop.permute.xlu1 %1176  ;;  %1432 = vmatprep.mubr.f32.mxu1 %v1245_v34  ;;  %v1212_v63 = vsel %vm451_vm1, %v1204_v23, %v2972_v52  ;;  %v1238_v16 = vsel %vm451_vm1, %v1230_v9, %v2973_v12 }
 0x341   : > { %v2976_v33 = vpop.permute.xlu0 %2975  ;;  %v1221_v3 = vsel %vm1219_vm9, %v1212_v63, %v2963_v51  ;;  %v955_v63 = vrot.slane %v3755_v8, 4 }
 0x342   : > { %1433 = vmatmul.mubr.f32.gmra.mrb[18].mxu1 %v1221_v3  ;;  %1533 = vmatmul.mubr.f32.vlgmr.msra.gmra.mrb[0].mxu0 %v1221_v3  ;;  %v2978_v36 = vunpack.i.h.bf16 %v2976_v33  ;;  %v2977_v29 = vunpack.i.l.bf16 %v2976_v33  ;;  %v956_v33 = vrot.slane %v3752_v7, 4 }
 0x343   : > { %2513 = vmatprep.mubr.msk.f32.mxu0 %vm1219_vm9, %v1268_v11 }
 0x344   : > { %v1194_v42 = vpop.permute.xlu1 %1193  ;;  %v1205_v5 = vsel %vm427_vm0, %v3655_v57, %v2977_v29  ;;  %v1252_v49 = vsel %vm427_vm0, %v3601_v25, %v2978_v36  ;;  %v957_v36 = vsel %vm944_vm8, %v955_v63, %v956_v33  ;;  %v961_v63 = vrot.slane %v3833_v60, 4 }
 0x345   : > { %v2986_v38 = vpop.permute.xlu0 %2985 }
 0x346   : > { %v2987_v1 = vunpack.i.l.bf16 %v2986_v38  ;;  %v2988_v47 = vunpack.i.h.bf16 %v2986_v38 }
 0x348   : > { %v2981_v0 = vpop.permute.xlu1 %2980  ;;  %v1246_v27 = vsel %vm1219_vm9, %v1238_v16, %v2987_v1 }
 0x349   : > { %v2983_v10 = vunpack.i.h.bf16 %v2981_v0  ;;  %v2982_v41 = vunpack.i.l.bf16 %v2981_v0  ;;  %v2991_v55 = vpop.permute.xlu0 %2990  ;;  %1437 = vmatprep.mubr.f32.mxu1 %v1246_v27  ;;  %v1162_v0 = vsel %vm944_vm8, %v953_v58, %v4024_v40 }
 0x34a   : > { %v2992_v39 = vunpack.i.l.bf16 %v2991_v55  ;;  %v2993_v35 = vunpack.i.h.bf16 %v2991_v55  ;;  %v1265_v16 = vsel %vm427_vm0, %v1162_v0, %v4029_v32 }
 0x34b   : > { %v1213_v21 = vsel %vm451_vm1, %v1205_v5, %v2982_v41  ;;  %v1256_v30 = vsel %vm451_vm1, %v1252_v49, %v2983_v10 }
 0x34c   : > { %v1001_v44 = vpop.permute.xlu1 %1000  ;;  %v1222_v46 = vsel %vm1219_vm9, %v1213_v21, %v2988_v47  ;;  %v1260_v57 = vsel %vm1219_vm9, %v1256_v30, %v2992_v39 }
 0x34d   : > { %v1231_v51 = vsel %vm427_vm0, %v954_v43, %v1001_v44  ;;  %1438 = vmatmul.mubr.f32.gmra.mrb[20].mxu1 %v1222_v46  ;;  %v1046_v34 = vpop.permute.xlu0 %1045  ;;  %1538 = vmatmul.mubr.f32.gmra.mrb[2].mxu0 %v1260_v57  ;;  %v958_v57 = vrot.slane %v3749_v6, 4 }
 0x34e   : > { %v1239_v25 = vsel %vm451_vm1, %v1231_v51, %v1046_v34 }
 0x34f   : > { %2514 = vmatprep.mubr.msk.f32.mxu0 %vm1219_vm9, %v1239_v25  ;;  %v1247_v52 = vsel %vm1219_vm9, %v1239_v25, %v2993_v35 }
 0x350   : > { %v4056_v2 = vpop.permute.xlu1 %1195  ;;  %1442 = vmatprep.mubr.f32.mxu1 %v1247_v52  ;;  %v959_v52 = vsel %vm944_vm8, %v956_v33, %v958_v57 }
 0x351   : > { %v1179_v45 = vpop.permute.xlu0 %1178 }
 0x354   : > { %v2996_v23 = vpop.permute.xlu1 %2995 }
 0x355   : > { %v2998_v3 = vunpack.i.h.bf16 %v2996_v23  ;;  %v2997_v14 = vunpack.i.l.bf16 %v2996_v23  ;;  %v3006_v59 = vpop.permute.xlu0 %3005 }
 0x356   : > { %v3008_v29 = vunpack.i.h.bf16 %v3006_v59  ;;  %v3007_v38 = vunpack.i.l.bf16 %v3006_v59 }
 0x357   : > { %v1206_v54 = vsel %vm427_vm0, %v3652_v56, %v2997_v14  ;;  %v1232_v1 = vsel %vm427_vm0, %v957_v36, %v2998_v3  ;;  %v1269_v56 = vsel %vm451_vm1, %v1265_v16, %v1194_v42  ;;  %v960_v3 = vrot.slane %v3836_v61, 4 }
 0x358   : > { %v3001_v11 = vpop.permute.xlu1 %3000  ;;  %v1163_v36 = vsel %vm944_vm8, %v958_v57, %v4024_v40 }
 0x359   : > { %v3003_v22 = vunpack.i.h.bf16 %v3001_v11  ;;  %v3002_v12 = vunpack.i.l.bf16 %v3001_v11  ;;  %v3016_v9 = vpop.permute.xlu0 %3015  ;;  %v1266_v33 = vsel %vm427_vm0, %v1163_v36, %v1179_v45 }
 0x35a   : > { %v3018_v58 = vunpack.i.h.bf16 %v3016_v9  ;;  %v3017_v21 = vunpack.i.l.bf16 %v3016_v9 }
 0x35b   : > { %v1214_v10 = vsel %vm451_vm1, %v1206_v54, %v3002_v12  ;;  %v1240_v41 = vsel %vm451_vm1, %v1232_v1, %v3003_v22  ;;  %v962_v54 = vsel %vm944_vm8, %v960_v3, %v961_v63 }
 0x35c   : > { %v3011_v47 = vpop.permute.xlu1 %3010  ;;  %v1223_v27 = vsel %vm1219_vm9, %v1214_v10, %v3007_v38  ;;  %v1248_v5 = vsel %vm1219_vm9, %v1240_v41, %v3008_v29 }
 0x35d   : > { %v3013_v49 = vunpack.i.h.bf16 %v3011_v47  ;;  %v3012_v55 = vunpack.i.l.bf16 %v3011_v47  ;;  %1443 = vmatmul.mubr.f32.gmra.mrb[22].mxu1 %v1223_v27  ;;  %1543 = vmatmul.mubr.f32.gmra.mrb[4].mxu0 %v1223_v27  ;;  %v3021_v30 = vpop.permute.xlu0 %3020 }
 0x35e   : > { %1447 = vmatprep.mubr.f32.mxu1 %v1248_v5  ;;  %2515 = vmatprep.mubr.msk.f32.mxu0 %vm1219_vm9, %v1269_v56  ;;  %v3023_v43 = vunpack.i.h.bf16 %v3021_v30  ;;  %v3022_v44 = vunpack.i.l.bf16 %v3021_v30 }
 0x35f   : > { %v1207_v32 = vsel %vm427_vm0, %v3755_v8, %v3012_v55  ;;  %v1253_v39 = vsel %vm427_vm0, %v3681_v15, %v3013_v49 }
 0x360   : > { %v3031_v46 = vpop.permute.xlu1 %3030  ;;  %v1215_v42 = vsel %vm451_vm1, %v1207_v32, %v3017_v21  ;;  %v1257_v51 = vsel %vm451_vm1, %v1253_v39, %v3018_v58  ;;  %v963_v21 = vrot.slane %v3941_v18, 4 }
 0x361   : > { %v1224_v35 = vsel %vm1219_vm9, %v1215_v42, %v3022_v44  ;;  %v1261_v34 = vsel %vm1219_vm9, %v1257_v51, %v3023_v43  ;;  %v1005_v25 = vpop.permute.xlu0 %1004  ;;  %v3033_v14 = vunpack.i.h.bf16 %v3031_v46  ;;  %v3032_v59 = vunpack.i.l.bf16 %v3031_v46 }
 0x362   : > { %1448 = vmatmul.mubr.f32.gmra.mrb[24].mxu1 %v1224_v35  ;;  %1548 = vmatmul.mubr.f32.gmra.mrb[6].mxu0 %v1261_v34  ;;  %v1233_v15 = vsel %vm427_vm0, %v959_v52, %v1005_v25  ;;  %v964_v57 = vsel %vm944_vm8, %v961_v63, %v963_v21 }
 0x363   : > { %v1208_v10 = vsel %vm427_vm0, %v3752_v7, %v3032_v59  ;;  %v1234_v41 = vsel %vm427_vm0, %v962_v54, %v3033_v14  ;;  %v1270_v7 = vsel %vm451_vm1, %v1266_v33, %v4056_v2 }
 0x364   : > { %v3036_v8 = vpop.permute.xlu1 %3035 }
 0x365   : > { %v1050_v23 = vpop.permute.xlu0 %1049  ;;  %v3037_v12 = vunpack.i.l.bf16 %v3036_v8  ;;  %v3038_v29 = vunpack.i.h.bf16 %v3036_v8 }
 0x366   : > { %v1241_v11 = vsel %vm451_vm1, %v1233_v15, %v1050_v23 }
 0x367   : > { %2516 = vmatprep.mubr.msk.f32.mxu0 %vm1219_vm9, %v1241_v11  ;;  %v1216_v5 = vsel %vm451_vm1, %v1208_v10, %v3037_v12  ;;  %v1242_v49 = vsel %vm451_vm1, %v1234_v41, %v3038_v29  ;;  %v2109_v41 = vld [vmem:[%s4833_s8 + $0x100] sm:$0xff] }
 0x368   : > { %v3041_v22 = vpop.permute.xlu1 %3040 }
 0x369   : > { %v3026_v38 = vpop.permute.xlu0 %3025  ;;  %v3043_v16 = vunpack.i.h.bf16 %v3041_v22  ;;  %v3042_v47 = vunpack.i.l.bf16 %v3041_v22 }
 0x36a   : > { %v3028_v1 = vunpack.i.h.bf16 %v3026_v38  ;;  %v3027_v0 = vunpack.i.l.bf16 %v3026_v38 }
 0x36b   : > { %v1209_v46 = vsel %vm427_vm0, %v3836_v61, %v3042_v47  ;;  %v1254_v42 = vsel %vm427_vm0, %v3749_v6, %v3043_v16  ;;  %v2093_v47 = vld [vmem:[%s4833_s8 + $0x80] sm:$0xff] }
 0x36c   : > { %v3051_v9 = vpop.permute.xlu1 %3050  ;;  %v1249_v56 = vsel %vm1219_vm9, %v1241_v11, %v3027_v0  ;;  %v1225_v45 = vsel %vm1219_vm9, %v1216_v5, %v3028_v1  ;;  %v1164_v1 = vsel %vm944_vm8, %v963_v21, %v4024_v40  ;;  %v2077_v5 = vld [vmem:[%s4833_s8] sm:$0xff]  ;;  %v2095_v21 = vld [vmem:[%s4833_s8 + $0x90] sm:$0xff] }
 0x36d   : > { %v3052_v27 = vunpack.i.l.bf16 %v3051_v9  ;;  %v3053_v55 = vunpack.i.h.bf16 %v3051_v9  ;;  %v3046_v58 = vpop.permute.xlu0 %3045  ;;  %1452 = vmatprep.mubr.f32.mxu1 %v1249_v56  ;;  %1553 = vmatmul.mubr.f32.gmra.mrb[8].mxu0 %v1225_v45 }
 0x36e   : > { %v3048_v32 = vunpack.i.h.bf16 %v3046_v58  ;;  %v3047_v39 = vunpack.i.l.bf16 %v3046_v58  ;;  %1453 = vmatmul.mubr.f32.gmra.mrb[26].mxu1 %v1225_v45  ;;  %2517 = vmatprep.mubr.msk.f32.mxu0 %vm1219_vm9, %v1270_v7  ;;  %v2078_v45 = vld [vmem:[%s4833_s8 + $0x8] sm:$0xff] }
 0x36f   : > { %v1250_v30 = vsel %vm1219_vm9, %v1242_v49, %v3052_v27  ;;  %v2094_v27 = vld [vmem:[%s4833_s8 + $0x88] sm:$0xff]  ;;  %v2111_v49 = vld [vmem:[%s4833_s8 + $0x110] sm:$0xff]  ;;  %v2826_v58 = vpack.c.bf16 %v2078_v45, %v2077_v5 }
 0x370   : > { %v3056_v43 = vpop.permute.xlu1 %3055  ;;  %1457 = vmatprep.mubr.f32.mxu1 %v1250_v30  ;;  %v1217_v2 = vsel %vm451_vm1, %v1209_v46, %v3047_v39  ;;  %v1258_v51 = vsel %vm451_vm1, %v1254_v42, %v3048_v32  ;;  %v2824_v56 = vpack.c.bf16 %v2094_v27, %v2093_v47  ;;  %v2096_v30 = vld [vmem:[%s4833_s8 + $0x98] sm:$0xff]  ;;  %v2079_v32 = vld [vmem:[%s4833_s8 + $0x10] sm:$0xff]  ;;  %v2114_v46 = vld [vmem:[%s4833_s8 + $0x128] sm:$0xff] }
 0x371   : > { %v3057_v44 = vunpack.i.l.bf16 %v3056_v43  ;;  %v1009_v35 = vpop.permute.xlu0 %1008  ;;  %v1226_v34 = vsel %vm1219_vm9, %v1217_v2, %v3053_v55  ;;  %v3058_v8 = vunpack.i.h.bf16 %v3056_v43  ;;  %v2112_v55 = vld [vmem:[%s4833_s8 + $0x118] sm:$0xff]  ;;  %v2828_v39 = vpack.c.bf16 %v2096_v30, %v2095_v21 }
 0x372   : > { %v1235_v52 = vsel %vm427_vm0, %v964_v57, %v1009_v35  ;;  %1458 = vmatmul.mubr.f32.gmra.mrb[28].mxu1 %v1226_v34  ;;  %v2860_v7 = vpack.c.bf16 %v2112_v55, %v2111_v49  ;;  %2825 = vmatprep.subr.bf16.mxu1 %v2824_v56  ;;  %v2080_v43 = vld [vmem:[%s4833_s8 + $0x18] sm:$0xff]  ;;  %v2098_v57 = vld [vmem:[%s4833_s8 + $0xa8] sm:$0xff]  ;;  %v2081_v35 = vld [vmem:[%s4833_s8 + $0x20] sm:$0xff] }
 0x373   : > { %v1262_v25 = vsel %vm1219_vm9, %v1258_v51, %v3057_v44  ;;  %2827 = vmatpush3.bf16.msra.mxu1 %v2826_v58  ;;  %v2113_v44 = vld [vmem:[%s4833_s8 + $0x120] sm:$0xff]  ;;  %v2830_v42 = vpack.c.bf16 %v2080_v43, %v2079_v32  ;;  %v2120_v47 = vld [vmem:[%s4833_s8 + $0x158] sm:$0xff]  ;;  %v2122_v43 = vld [vmem:[%s4833_s8 + $0x168] sm:$0xff] }
 0x374   : > { %v1054_v15 = vpop.permute.xlu1 %1053  ;;  %1558 = vmatmul.mubr.f32.gmra.mrb[10].mxu0 %v1262_v25  ;;  %v2863_v2 = vpack.c.bf16 %v2114_v46, %v2113_v44  ;;  %v2097_v51 = vld [vmem:[%s4833_s8 + $0xa0] sm:$0xff]  ;;  %2829 = vmatprep.subr.bf16.mxu1 %v2828_v39  ;;  %v2082_v25 = vld [vmem:[%s4833_s8 + $0x28] sm:$0xff]  ;;  %v2088_v21 = vld [vmem:[%s4833_s8 + $0x58] sm:$0xff] }
 0x375   : > { %v1243_v61 = vsel %vm451_vm1, %v1235_v52, %v1054_v15  ;;  %v3061_v23 = vpop.permute.xlu0 %3060  ;;  %v2832_v34 = vpack.c.bf16 %v2098_v57, %v2097_v51  ;;  %v2116_v52 = vld [vmem:[%s4833_s8 + $0x138] sm:$0xff]  ;;  %v2121_v39 = vld [vmem:[%s4833_s8 + $0x160] sm:$0xff] }
 0x376   : > { %2518 = vmatprep.mubr.msk.f32.mxu0 %vm1219_vm9, %v1243_v61  ;;  %v1251_v6 = vsel %vm1219_vm9, %v1243_v61, %v3058_v8  ;;  %v3062_v63 = vunpack.i.l.bf16 %v3061_v23  ;;  %v3063_v12 = vunpack.i.h.bf16 %v3061_v23  ;;  %v2115_v8 = vld [vmem:[%s4833_s8 + $0x130] sm:$0xff]  ;;  %v2834_v61 = vpack.c.bf16 %v2082_v25, %v2081_v35  ;;  %v2100_v23 = vld [vmem:[%s4833_s8 + $0xb8] sm:$0xff] }
 0x377   : > { %1462 = vmatprep.mubr.f32.mxu1 %v1251_v6  ;;  %2831 = vmatpush3.bf16.msra.mxu1 %v2830_v42  ;;  %v2099_v6 = vld [vmem:[%s4833_s8 + $0xb0] sm:$0xff]  ;;  %v2875_v42 = vpack.c.bf16 %v2122_v43, %v2121_v39 }
 0x378   : > { %v935_v3 = vpop.permute.xlu1 %934  ;;  %v1210_v14 = vsel %vm427_vm0, %v3833_v60, %v3062_v63  ;;  %v1255_v38 = vsel %vm427_vm0, %v3941_v18, %v3063_v12  ;;  %v2110_v18 = vld [vmem:[%s4833_s8 + $0x108] sm:$0xff]  ;;  %2833 = vmatprep.subr.bf16.mxu1 %v2832_v34  ;;  %v2101_v12 = vld [vmem:[%s4833_s8 + $0xc0] sm:$0xff] }
 0x379   : > { %v890_v59 = vpop.permute.xlu0 %889  ;;  %v2857_v16 = vpack.c.bf16 %v2110_v18, %v2109_v41  ;;  %v2104_v41 = vld [vmem:[%s4833_s8 + $0xd8] sm:$0xff] }
 0x37a   : > { %v1218_v11 = vsel %vm451_vm1, %v1210_v14, %v890_v59  ;;  %v2083_v14 = vld [vmem:[%s4833_s8 + $0x30] sm:$0xff]  ;;  %v2084_v59 = vld [vmem:[%s4833_s8 + $0x38] sm:$0xff] }
 0x37b   : > { %v1227_v36 = vsel %vm1219_vm9, %v1218_v11, %v935_v3  ;;  %2858 = vmatpush1.bf16.msra.mxu0 %v2857_v16  ;;  %v2836_v3 = vpack.c.bf16 %v2100_v23, %v2099_v6  ;;  %2835 = vmatpush3.bf16.msra.mxu1 %v2834_v61  ;;  %v2119_v16 = vld [vmem:[%s4833_s8 + $0x150] sm:$0xff]  ;;  %v2106_v61 = vld [vmem:[%s4833_s8 + $0xe8] sm:$0xff]  ;;  %v2089_v6 = vld [vmem:[%s4833_s8 + $0x60] sm:$0xff] }
 0x37c   : > { %v1138_v22 = vpop.permute.xlu1 %1137  ;;  %1463 = vmatmul.mubr.f32.gmra.mrb[30].mxu1 %v1227_v36  ;;  %1563 = vmatmul.mubr.f32.gmra.mrb[12].mxu0 %v1227_v36  ;;  %v2102_v36 = vld [vmem:[%s4833_s8 + $0xc8] sm:$0xff]  ;;  %v2872_v32 = vpack.c.bf16 %v2120_v47, %v2119_v16 }
 0x37d   : > { %v1181_v29 = vpop.permute.xlu0 %1180  ;;  %v1259_v54 = vsel %vm451_vm1, %v1255_v38, %v1138_v22  ;;  %2859 = vmatprep.subr.bf16.mxu0 %v3250_v13  ;;  %v2866_v22 = vpack.c.bf16 %v2116_v52, %v2115_v8  ;;  %v4223_v38 = vld [vmem:[%s4832_s7] ss:$0 sm:$0xff]  ;;  %2837 = vmatprep.subr.bf16.mxu1 %v2836_v3 }
 0x37e   : > { %v1267_v60 = vsel %vm427_vm0, %v1164_v1, %v1181_v29  ;;  %v2117_v29 = vld [vmem:[%s4833_s8 + $0x140] sm:$0xff]  ;;  %v2840_v1 = vpack.c.bf16 %v2102_v36, %v2101_v12  ;;  %v2107_v36 = vld [vmem:[%s4833_s8 + $0xf0] sm:$0xff] }
 0x37f   : > { %2861 = vmatpush1.bf16.msra.mxu0 %v2860_v7  ;;  %v2087_v7 = vld [vmem:[%s4833_s8 + $0x50] sm:$0xff] }
 0x380   : > { %v1155_v33 = vpop.permute.xlu1 %1154  ;;  %2862 = vmatprep.subr.bf16.mxu0 %v3250_v13  ;;  %v2846_v44 = vpack.c.bf16 %v2088_v21, %v2087_v7 }
 0x381   : > { %v1198_v0 = vpop.permute.xlu0 %1197  ;;  %v1263_v9 = vsel %vm1219_vm9, %v1259_v54, %v1155_v33  ;;  %v2118_v33 = vld [vmem:[%s4833_s8 + $0x148] sm:$0xff]  ;;  %v2838_v54 = vpack.c.bf16 %v2084_v59, %v2083_v14  ;;  %v2123_v59 = vld [vmem:[%s4833_s8 + $0x170] sm:$0xff] }
 0x382   : > { %v1271_v10 = vsel %vm451_vm1, %v1267_v60, %v1198_v0  ;;  %v2085_v60 = vld [vmem:[%s4833_s8 + $0x40] sm:$0xff]  ;;  %v2086_v0 = vld [vmem:[%s4833_s8 + $0x48] sm:$0xff] }
 0x383   : > { %2519 = vmatprep.mubr.msk.f32.mxu0 %vm1219_vm9, %v1271_v10  ;;  %2864 = vmatpush1.bf16.msra.mxu0 %v2863_v2  ;;  %v2103_v10 = vld [vmem:[%s4833_s8 + $0xd0] sm:$0xff]  ;;  %v2842_v56 = vpack.c.bf16 %v2086_v0, %v2085_v60  ;;  %v2090_v14 = vld [vmem:[%s4833_s8 + $0x68] sm:$0xff]  ;;  %v2092_v60 = vld [vmem:[%s4833_s8 + $0x78] sm:$0xff] }
 0x384   : > { %1568 = vmatmul.mubr.f32.gmra.mrb[14].mxu0 %v1263_v9  ;;  %2865 = vmatprep.subr.bf16.mxu0 %v3250_v13  ;;  %v2869_v9 = vpack.c.bf16 %v2118_v33, %v2117_v29  ;;  %v2844_v58 = vpack.c.bf16 %v2104_v41, %v2103_v10  ;;  %v2108_v29 = vld [vmem:[%s4833_s8 + $0xf8] sm:$0xff]  ;;  %v2091_v33 = vld [vmem:[%s4833_s8 + $0x70] sm:$0xff]  ;;  %v2125_v0 = vld [vmem:[%s4833_s8 + $0x180] sm:$0xff] }
 0x385   : > { %2839 = vmatpush3.bf16.msra.mxu1 %v2838_v54  ;;  %v2854_v16 = vpack.c.bf16 %v2092_v60, %v2091_v33 }
 0x386   : > { %2841 = vmatprep.subr.bf16.mxu1 %v2840_v1  ;;  %v2852_v1 = vpack.c.bf16 %v2108_v29, %v2107_v36  ;;  %v2129_v36 = vld [vmem:[%s4833_s8 + $0x1a0] sm:$0xff]  ;;  %v2130_v29 = vld [vmem:[%s4833_s8 + $0x1a8] sm:$0xff] }
 0x387   : > { %2867 = vmatpush1.bf16.msra.mxu0 %v2866_v22  ;;  %v2850_v22 = vpack.c.bf16 %v2090_v14, %v2089_v6 }
 0x388   : > { %2868 = vmatprep.subr.bf16.mxu0 %v3250_v13 }
 0x389   : > { %2843 = vmatpush3.bf16.msra.mxu1 %v2842_v56 }
 0x38a   : > { %2845 = vmatprep.subr.bf16.mxu1 %v2844_v58 }
 0x38b   : > { %2870 = vmatpush1.bf16.msra.mxu0 %v2869_v9  ;;  %v2126_v9 = vld [vmem:[%s4833_s8 + $0x188] sm:$0xff] }
 0x38c   : > { %2871 = vmatprep.subr.bf16.mxu0 %v3250_v13  ;;  %v2881_v56 = vpack.c.bf16 %v2126_v9, %v2125_v0  ;;  %v2887_v0 = vpack.c.bf16 %v2130_v29, %v2129_v36 }
 0x38d   : > { %2847 = vmatpush3.bf16.msra.mxu1 %v2846_v44 }
 0x38f   : > { %2873 = vmatpush1.bf16.msra.mxu0 %v2872_v32 }
 0x390   : > { %2874 = vmatprep.subr.bf16.mxu0 %v3250_v13 }
 0x393   : > { %2876 = vmatpush1.bf16.msra.mxu0 %v2875_v42 }
 0x394   : > { %2877 = vmatprep.subr.bf16.mxu0 %v3250_v13 }
 0x40d   : > { %v2598_v15 = vpop.f32.mrb[16].mxu1 }
 0x40e   : > { %v2599_v63 = vpop.f32.mrb[17].mxu1 }
 0x40f   : > { %v2600_v11 = vadd.f32 %v2599_v63, %v2598_v15  ;;  %v2105_v15 = vld [vmem:[%s4833_s8 + $0xe0] sm:$0xff] }
 0x410   : > { %v2848_v3 = vpack.c.bf16 %v2106_v61, %v2105_v15  ;;  %v2127_v15 = vld [vmem:[%s4833_s8 + $0x190] sm:$0xff]  ;;  %v2128_v61 = vld [vmem:[%s4833_s8 + $0x198] sm:$0xff] }
 0x411   : > { %v1430_v18 = vadd.f32 %v2600_v11, %v4223_v38  ;;  %v2124_v11 = vld [vmem:[%s4833_s8 + $0x178] sm:$0xff] }
 0x412   : > { %v2878_v12 = vpack.c.bf16 %v2124_v11, %v2123_v59  ;;  %2849 = vmatprep.subr.bf16.mxu1 %v2848_v3 }
 0x413   : > { %2851 = vmatpush3.bf16.msra.mxu1 %v2850_v22 }
 0x414   : > { %2879 = vmatpush1.bf16.msra.mxu0 %v2878_v12  ;;  %2853 = vmatprep.subr.bf16.mxu1 %v2852_v1 }
 0x415   : > { %v2601_v27 = vpop.f32.mrb[18].mxu1  ;;  %v1534_v5 = vpop.f32.mrb[0].mxu0  ;;  %2880 = vmatprep.subr.bf16.mxu0 %v3250_v13 }
 0x416   : > { %v1535_v45 = vadd.f32 %v1534_v5, %v1430_v18  ;;  %v2602_v49 = vpop.f32.mrb[19].mxu1  ;;  %v1536_v55 = vpop.f32.mrb[1].mxu0 }
 0x417   : > { %v2603_v30 = vadd.f32 %v2602_v49, %v2601_v27  ;;  %2855 = vmatpush3.bf16.msra.mxu1 %v2854_v16 }
 0x418   : > { %v1573_v46 = vmax.f32 %v1535_v45, 0.0  ;;  %2882 = vmatpush1.bf16.msra.mxu0 %v2881_v56  ;;  %v2132_v56 = vld [vmem:[%s4833_s8 + $0x1b8] sm:$0xff] }
 0x419   : > { %v1435_v57 = vadd.f32 %v2603_v30, %v4223_v38  ;;  %2883 = vmatprep.subr.bf16.mxu0 %v3250_v13 }
 0x41a   : > { %v1589_v51 = vrot.slane %v1573_v46, 1 }
 0x41c   : > { %v4271_v23 = vsel %vm769_vm2, 0.0, %v1589_v51 }
 0x41d   : > { %v1673_v10 = vrot.slane %v4271_v23, 2  ;;  %v1833_v41 = vrot.slane %v4271_v23, 6  ;;  %v1629_v18 = vrot.slane %v4271_v23, 1  ;;  %v1789_v27 = vrot.slane %v4271_v23, 5 }
 0x41e   : > { %v1717_v5 = vrot.slane %v4271_v23, 3  ;;  %v1877_v30 = vrot.slane %v4271_v23, 7 }
 0x420   : > { %v2604_v2 = vpop.f32.mrb[20].mxu1  ;;  %v1539_v34 = vpop.f32.mrb[2].mxu0 }
 0x421   : > { %v2605_v35 = vpop.f32.mrb[21].mxu1  ;;  %v1540_v8 = vadd.f32 %v1539_v34, %v1435_v57  ;;  %v1541_v52 = vpop.f32.mrb[3].mxu0 }
 0x422   : > { %v2606_v25 = vadd.f32 %v2605_v35, %v2604_v2 }
 0x423   : > { %v1574_v63 = vmax.f32 %v1540_v8, 0.0 }
 0x424   : > { %v1440_v34 = vadd.f32 %v2606_v25, %v4223_v38 }
 0x425   : > { %v1590_v54 = vrot.slane %v1574_v63, 1 }
 0x427   : > { %v4304_v47 = vsel %vm769_vm2, %v1589_v51, %v1590_v54  ;;  %v4314_v7 = vsel %vm769_vm2, %v1590_v54, 0.0  ;;  %v2884_v54 = vpack.c.bf16 %v2128_v61, %v2127_v15 }
 0x428   : > { %v1674_v45 = vrot.slane %v4304_v47, 2  ;;  %v1834_v49 = vrot.slane %v4304_v47, 6  ;;  %v1630_v55 = vrot.slane %v4304_v47, 1  ;;  %v1790_v58 = vrot.slane %v4304_v47, 5 }
 0x429   : > { %v1718_v21 = vrot.slane %v4304_v47, 3  ;;  %v1878_v32 = vrot.slane %v4304_v47, 7  ;;  %v1792_v51 = vrot.slane %v4314_v7, 5  ;;  %v1836_v59 = vrot.slane %v4314_v7, 6  ;;  %2885 = vmatpush1.bf16.msra.mxu0 %v2884_v54 }
 0x42a   : > { %v1675_v39 = vsel %vm854_vm5, %v1673_v10, %v1674_v45  ;;  %v1835_v43 = vsel %vm1018_vm3, %v1833_v41, %v1834_v49  ;;  %v1631_v44 = vsel %vm769_vm2, %v1629_v18, %v1630_v55  ;;  %v1791_v46 = vsel %vm973_vm4, %v1789_v27, %v1790_v58  ;;  %2886 = vmatprep.subr.bf16.mxu0 %v3250_v13 }
 0x42b   : > { %v3069_v42 = vpack.i.bf16 %v1675_v39, %v1835_v43  ;;  %v3064_v2 = vpack.i.bf16 %v1631_v44, %v1791_v46  ;;  %v1719_v57 = vsel %vm899_vm6, %v1717_v5, %v1718_v21  ;;  %v1879_v35 = vsel %vm1063_vm7, %v1877_v30, %v1878_v32  ;;  %v2131_v5 = vld [vmem:[%s4833_s8 + $0x1b0] sm:$0xff]  ;;  %v2133_v46 = vld [vmem:[%s4833_s8 + $0x1c0] sm:$0xff] }
 0x42c   : > { %v3074_v14 = vpack.i.bf16 %v1719_v57, %v1879_v35  ;;  %v1793_v22 = vsel %vm973_vm4, %v1790_v58, %v1792_v51  ;;  %v1720_v25 = vrot.slane %v4314_v7, 3  ;;  %v1880_v12 = vrot.slane %v4314_v7, 7 }
 0x42d   : > { %3070 = vrot.lane.b32.xlu1 %v3069_v42, %s4850_s29  ;;  %3065 = vrot.lane.b32.xlu0 %v3064_v2, %s4848_s20  ;;  %v1837_v60 = vsel %vm1018_vm3, %v1834_v49, %v1836_v59  ;;  %v1993_v18 = vsel %vm1018_vm3, %v1836_v59, %v3598_v24  ;;  %v2890_v43 = vpack.c.bf16 %v2132_v56, %v2131_v5  ;;  %v2134_v42 = vld [vmem:[%s4833_s8 + $0x1c8] sm:$0xff]  ;;  %v1676_v57 = vrot.slane %v4314_v7, 2 }
 0x42e   : > { %v1721_v16 = vsel %vm899_vm6, %v1718_v21, %v1720_v25  ;;  %v1881_v27 = vsel %vm1063_vm7, %v1878_v32, %v1880_v12  ;;  %2888 = vmatpush1.bf16.msra.mxu0 %v2887_v0  ;;  %v1632_v35 = vrot.slane %v4314_v7, 1  ;;  %v2893_v15 = vpack.c.bf16 %v2134_v42, %v2133_v46 }
 0x42f   : > { %v3079_v32 = vpack.i.bf16 %v1721_v16, %v1881_v27  ;;  %2889 = vmatprep.subr.bf16.mxu0 %v3250_v13  ;;  %v1677_v5 = vsel %vm854_vm5, %v1674_v45, %v1676_v57 }
 0x430   : > { %v2607_v8 = vpop.f32.mrb[22].mxu1  ;;  %v1544_v52 = vpop.f32.mrb[4].mxu0  ;;  %v1633_v12 = vsel %vm769_vm2, %v1630_v55, %v1632_v35 }
 0x431   : > { %v1545_v6 = vadd.f32 %v1544_v52, %v1440_v34  ;;  %v2608_v63 = vpop.f32.mrb[23].mxu1  ;;  %v1546_v3 = vpop.f32.mrb[5].mxu0  ;;  %1811 = vrot.lane.b32.xlu1 %v1793_v22, %s4848_s20  ;;  %3075 = vrot.lane.b32.xlu0 %v3074_v14, %s4849_s26  ;;  %v2135_v14 = vld [vmem:[%s4833_s8 + $0x1d0] sm:$0xff] }
 0x432   : > { %v2609_v11 = vadd.f32 %v2608_v63, %v2607_v8  ;;  %v1977_v8 = vsel %vm973_vm4, %v1792_v51, %v3607_v28  ;;  %2891 = vmatpush1.bf16.msra.mxu0 %v2890_v43  ;;  %v2136_v51 = vld [vmem:[%s4833_s8 + $0x1d8] sm:$0xff] }
 0x433   : > { %v1575_v33 = vmax.f32 %v1545_v6, 0.0  ;;  %2892 = vmatprep.subr.bf16.mxu0 %v3250_v13 }
 0x434   : > { %v1445_v1 = vadd.f32 %v2609_v11, %v4223_v38  ;;  %v1937_v11 = vsel %vm854_vm5, %v1676_v57, %v3725_v53  ;;  %v1921_v57 = vsel %vm769_vm2, %v1632_v35, %v3698_v37 }
 0x435   : > { %v1592_v9 = vrot.slane %v1575_v33, 1  ;;  %v2610_v10 = vpop.f32.mrb[24].mxu1  ;;  %v1549_v41 = vpop.f32.mrb[6].mxu0  ;;  %1855 = vrot.lane.b32.xlu1 %v1837_v60, %s4850_s29  ;;  %1997 = vrot.lane.b32.xlu0 %v1993_v18, %s4850_s29  ;;  %v2896_v60 = vpack.c.bf16 %v2136_v51, %v2135_v14 }
 0x436   : > { %v1550_v49 = vadd.f32 %v1549_v41, %v1445_v1  ;;  %v2611_v58 = vpop.f32.mrb[25].mxu1  ;;  %v1551_v30 = vpop.f32.mrb[7].mxu0  ;;  %2894 = vmatpush1.bf16.msra.mxu0 %v2893_v15 }
 0x437   : > { %v2612_v21 = vadd.f32 %v2611_v58, %v2610_v10  ;;  %v4370_v44 = vsel %vm769_vm2, 0.0, %v1592_v9  ;;  %2895 = vmatprep.subr.bf16.mxu0 %v3250_v13 }
 0x438   : > { %v1576_v39 = vmax.f32 %v1550_v49, 0.0  ;;  %v1678_v52 = vrot.slane %v4370_v44, 2  ;;  %v1794_v6 = vrot.slane %v4370_v44, 5  ;;  %v1838_v29 = vrot.slane %v4370_v44, 6 }
 0x439   : > { %3080 = vrot.lane.b32.xlu1 %v3079_v32, %s4849_s26  ;;  %v1450_v33 = vadd.f32 %v2612_v21, %v4223_v38  ;;  %v1634_v56 = vrot.slane %v4370_v44, 1  ;;  %v1882_v15 = vrot.slane %v4370_v44, 7 }
 0x43a   : > { %v1593_v2 = vrot.slane %v1576_v39, 1  ;;  %2897 = vmatpush1.bf16.msra.mxu0 %v2896_v60 }
 0x43c   : > { %v4383_v34 = vsel %vm769_vm2, %v1592_v9, %v1593_v2  ;;  %v4400_v59 = vsel %vm769_vm2, %v1593_v2, 0.0 }
 0x43d   : > { %v1679_v61 = vrot.slane %v4383_v34, 2  ;;  %v1795_v63 = vrot.slane %v4383_v34, 5  ;;  %v1839_v3 = vrot.slane %v4383_v34, 6  ;;  %1981 = vrot.lane.b32.xlu1 %v1977_v8, %s4848_s20  ;;  %v1797_v9 = vrot.slane %v4400_v59, 5 }
 0x43e   : > { %v1635_v41 = vrot.slane %v4383_v34, 1  ;;  %v1723_v39 = vrot.slane %v4383_v34, 3  ;;  %v1883_v32 = vrot.slane %v4383_v34, 7  ;;  %v1841_v8 = vrot.slane %v4400_v59, 6 }
 0x43f   : > { %v1680_v22 = vsel %vm854_vm5, %v1678_v52, %v1679_v61  ;;  %v1796_v36 = vsel %vm973_vm4, %v1794_v6, %v1795_v63  ;;  %v1840_v10 = vsel %vm1018_vm3, %v1838_v29, %v1839_v3  ;;  %v1798_v13 = vsel %vm973_vm4, %v1795_v63, %v1797_v9 }
 0x440   : > { %v3099_v54 = vpack.i.bf16 %v1937_v11, %v1680_v22  ;;  %v3084_v1 = vpack.i.bf16 %v1796_v36, %v1633_v12  ;;  %v1554_v0 = vpop.f32.mrb[8].mxu0  ;;  %v3089_v30 = vpack.i.bf16 %v1840_v10, %v1677_v5  ;;  %v1636_v21 = vsel %vm769_vm2, %v1634_v56, %v1635_v41 }
 0x441   : > { %v1555_v55 = vadd.f32 %v1554_v0, %v1450_v33  ;;  %v2613_v18 = vpop.f32.mrb[26].mxu1  ;;  %v1556_v16 = vpop.f32.mrb[9].mxu0  ;;  %v1722_v52 = vrot.slane %v4370_v44, 3  ;;  %v3094_v51 = vpack.i.bf16 %v1921_v57, %v1636_v21  ;;  %v1978_v11 = vsel %vm973_vm4, %v1797_v9, %v3607_v28 }
 0x442   : > { %3100 = vrot.lane.b32.xlu1 %v3099_v54, %s4850_s29  ;;  %3085 = vrot.lane.b32.xlu0 %v3084_v1, %s4848_s20  ;;  %v2614_v27 = vpop.f32.mrb[27].mxu1  ;;  %v1884_v12 = vsel %vm1063_vm7, %v1882_v15, %v1883_v32  ;;  %v1885_v35 = vrot.slane %v4400_v59, 7  ;;  %v1637_v1 = vrot.slane %v4400_v59, 1  ;;  %v1994_v60 = vsel %vm1018_vm3, %v1841_v8, %v3598_v24 }
 0x443   : > { %v1577_v49 = vmax.f32 %v1555_v55, 0.0  ;;  %v2615_v58 = vadd.f32 %v2614_v27, %v2613_v18  ;;  %v1724_v22 = vsel %vm899_vm6, %v1722_v52, %v1723_v39  ;;  %v1953_v10 = vsel %vm899_vm6, %v1720_v25, %v3742_v62 }
 0x444   : > { %v3104_v54 = vpack.i.bf16 %v1724_v22, %v1884_v12  ;;  %v1886_v0 = vsel %vm1063_vm7, %v1883_v32, %v1885_v35  ;;  %v1842_v15 = vsel %vm1018_vm3, %v1839_v3, %v1841_v8 }
 0x445   : > { %v2616_v43 = vpop.f32.mrb[28].mxu1  ;;  %v1455_v45 = vadd.f32 %v2615_v58, %v4223_v38  ;;  %v1595_v6 = vrot.slane %v1577_v49, 1  ;;  %v3109_v49 = vpack.i.bf16 %v1886_v0, %v1953_v10  ;;  %v1638_v58 = vsel %vm769_vm2, %v1635_v41, %v1637_v1 }
 0x446   : > { %1815 = vrot.lane.b32.xlu1 %v1798_v13, %s4848_s20  ;;  %3090 = vrot.lane.b32.xlu0 %v3089_v30, %s4850_s29  ;;  %v2617_v42 = vpop.f32.mrb[29].mxu1  ;;  %v1681_v30 = vrot.slane %v4400_v59, 2 }
 0x447   : > { %v1559_v46 = vpop.f32.mrb[10].mxu0  ;;  %v2618_v63 = vadd.f32 %v2617_v42, %v2616_v43  ;;  %v4448_v29 = vsel %vm769_vm2, 0.0, %v1595_v6 }
 0x448   : > { %v1561_v2 = vpop.f32.mrb[11].mxu0  ;;  %v1560_v14 = vadd.f32 %v1559_v46, %v1455_v45  ;;  %v1799_v18 = vrot.slane %v4448_v29, 5  ;;  %v1843_v43 = vrot.slane %v4448_v29, 6  ;;  %v1887_v57 = vrot.slane %v4448_v29, 7 }
 0x449   : > { %v1460_v55 = vadd.f32 %v2618_v63, %v4223_v38  ;;  %v1725_v2 = vrot.slane %v4400_v59, 3  ;;  %v1683_v8 = vrot.slane %v4448_v29, 2 }
 0x44a   : > { %v1578_v36 = vmax.f32 %v1560_v14, 0.0  ;;  %1983 = vrot.lane.b32.xlu1 %v1978_v11, %s4848_s20  ;;  %3095 = vrot.lane.b32.xlu0 %v3094_v51, %s4848_s20  ;;  %v1639_v51 = vrot.slane %v4448_v29, 1 }
 0x44b   : > { %v1726_v3 = vsel %vm899_vm6, %v1723_v39, %v1725_v2 }
 0x44c   : > { %v1596_v33 = vrot.slane %v1578_v36, 1 }
 0x44e   : > { %v4455_v9 = vsel %vm769_vm2, %v1595_v6, %v1596_v33  ;;  %1999 = vrot.lane.b32.xlu1 %v1994_v60, %s4850_s29  ;;  %3105 = vrot.lane.b32.xlu0 %v3104_v54, %s4849_s26  ;;  %v1682_v6 = vsel %vm854_vm5, %v1679_v61, %v1681_v30  ;;  %v4501_v35 = vsel %vm769_vm2, %v1596_v33, 0.0  ;;  %v1922_v60 = vsel %vm769_vm2, %v1637_v1, %v3698_v37 }
 0x44f   : > { %v1800_v16 = vrot.slane %v4455_v9, 5  ;;  %v1844_v27 = vrot.slane %v4455_v9, 6  ;;  %v2619_v5 = vpop.f32.mrb[30].mxu1  ;;  %v1564_v56 = vpop.f32.mrb[12].mxu0  ;;  %v1888_v45 = vrot.slane %v4455_v9, 7  ;;  %v1640_v52 = vrot.slane %v4455_v9, 1 }
 0x450   : > { %v1565_v13 = vadd.f32 %v1564_v56, %v1460_v55  ;;  %v2620_v21 = vpop.f32.mrb[31].mxu1  ;;  %v1566_v32 = vpop.f32.mrb[13].mxu0  ;;  %v1684_v11 = vrot.slane %v4455_v9, 2  ;;  %v1728_v39 = vrot.slane %v4455_v9, 3  ;;  %v1938_v33 = vsel %vm854_vm5, %v1681_v30, %v3725_v53 }
 0x451   : > { %v1801_v25 = vsel %vm973_vm4, %v1799_v18, %v1800_v16  ;;  %v2621_v46 = vadd.f32 %v2620_v21, %v2619_v5  ;;  %v1845_v41 = vsel %vm1018_vm3, %v1843_v43, %v1844_v27  ;;  %v1889_v14 = vsel %vm1063_vm7, %v1887_v57, %v1888_v45 }
 0x452   : > { %3110 = vrot.lane.b32.xlu0 %v3109_v49, %s4849_s26  ;;  %v3114_v42 = vpack.i.bf16 %v1801_v25, %v1638_v58  ;;  %v1579_v63 = vmax.f32 %v1565_v13, 0.0  ;;  %v3119_v22 = vpack.i.bf16 %v1845_v41, %v1682_v6  ;;  %v1641_v61 = vsel %vm769_vm2, %v1639_v51, %v1640_v52 }
 0x453   : > { %v1465_v12 = vadd.f32 %v2621_v46, %v4223_v38  ;;  %v3124_v54 = vpack.i.bf16 %v1889_v14, %v1726_v3  ;;  %v1685_v55 = vsel %vm854_vm5, %v1683_v8, %v1684_v11  ;;  %v3129_v18 = vpack.i.bf16 %v1922_v60, %v1641_v61 }
 0x454   : > { %3115 = vrot.lane.b32.xlu1 %v3114_v42, %s4848_s20  ;;  %v1598_v0 = vrot.slane %v1579_v63, 1  ;;  %v1846_v56 = vrot.slane %v4501_v35, 6  ;;  %v1727_v49 = vrot.slane %v4448_v29, 3  ;;  %v3134_v1 = vpack.i.bf16 %v1938_v33, %v1685_v55 }
 0x455   : > { %v1642_v32 = vrot.slane %v4501_v35, 1  ;;  %v1954_v43 = vsel %vm899_vm6, %v1725_v2, %v3742_v62  ;;  %v1686_v14 = vrot.slane %v4501_v35, 2  ;;  %v1730_v61 = vrot.slane %v4501_v35, 3 }
 0x456   : > { %1859 = vrot.lane.b32.xlu0 %v1842_v15, %s4850_s29  ;;  %v4515_v58 = vsel %vm769_vm2, 0.0, %v1598_v0  ;;  %v1729_v21 = vsel %vm899_vm6, %v1727_v49, %v1728_v39  ;;  %v1995_v30 = vsel %vm1018_vm3, %v1846_v56, %v3598_v24  ;;  %v1802_v15 = vrot.slane %v4501_v35, 5 }
 0x457   : > { %v1569_v36 = vpop.f32.mrb[14].mxu0  ;;  %v3139_v46 = vpack.i.bf16 %v1954_v43, %v1729_v21  ;;  %v1804_v42 = vrot.slane %v4515_v58, 5  ;;  %v1643_v6 = vsel %vm769_vm2, %v1640_v52, %v1642_v32  ;;  %v1848_v2 = vrot.slane %v4515_v58, 6 }
 0x458   : > { %3120 = vrot.lane.b32.xlu1 %v3119_v22, %s4850_s29  ;;  %v1570_v38 = vadd.f32 %v1569_v36, %v1465_v12  ;;  %v1571_v10 = vpop.f32.mrb[15].mxu0  ;;  %v1803_v3 = vsel %vm973_vm4, %v1800_v16, %v1802_v15  ;;  %v1890_v52 = vrot.slane %v4501_v35, 7  ;;  %v1687_v8 = vsel %vm854_vm5, %v1684_v11, %v1686_v14 }
 0x459   : > { %v1644_v36 = vrot.slane %v4515_v58, 1  ;;  %v1847_v16 = vsel %vm1018_vm3, %v1844_v27, %v1846_v56  ;;  %v1731_v11 = vsel %vm899_vm6, %v1728_v39, %v1730_v61  ;;  %v1892_v33 = vrot.slane %v4515_v58, 7 }
 0x45a   : > { %3125 = vrot.lane.b32.xlu0 %v3124_v54, %s4849_s26  ;;  %v1580_v5 = vmax.f32 %v1570_v38, 0.0  ;;  %v1891_v55 = vsel %vm1063_vm7, %v1888_v45, %v1890_v52  ;;  %v1688_v21 = vrot.slane %v4515_v58, 2 }
 0x45c   : > { %3130 = vrot.lane.b32.xlu1 %v3129_v18, %s4848_s20  ;;  %v1599_v13 = vrot.slane %v1580_v5, 1  ;;  %v1923_v18 = vsel %vm769_vm2, %v1642_v32, %v3698_v37  ;;  %v1732_v5 = vrot.slane %v4515_v58, 3 }
 0x45e   : > { %3135 = vrot.lane.b32.xlu0 %v3134_v1, %s4850_s29  ;;  %v4521_v25 = vsel %vm769_vm2, %v1598_v0, %v1599_v13  ;;  %v4552_v10 = vsel %vm769_vm2, %v1599_v13, 0.0  ;;  %v3144_v1 = vpack.i.bf16 %v1731_v11, %v1891_v55 }
 0x45f   : > { %v1805_v41 = vrot.slane %v4521_v25, 5  ;;  %v1849_v57 = vrot.slane %v4521_v25, 6  ;;  %v1645_v12 = vrot.slane %v4521_v25, 1  ;;  %v1733_v0 = vrot.slane %v4521_v25, 3 }
 0x460   : > { %2001 = vrot.lane.b32.xlu1 %v1995_v30, %s4850_s29  ;;  %v1893_v38 = vrot.slane %v4521_v25, 7  ;;  %v1895_v39 = vrot.slane %v4552_v10, 7  ;;  %v1689_v45 = vrot.slane %v4521_v25, 2  ;;  %v1979_v30 = vsel %vm973_vm4, %v1802_v15, %v3607_v28 }
 0x461   : > { %v1806_v63 = vsel %vm973_vm4, %v1804_v42, %v1805_v41  ;;  %v1850_v22 = vsel %vm1018_vm3, %v1848_v2, %v1849_v57  ;;  %v1646_v60 = vsel %vm769_vm2, %v1644_v36, %v1645_v12  ;;  %v1734_v13 = vsel %vm899_vm6, %v1732_v5, %v1733_v0 }
 0x462   : > { %3140 = vrot.lane.b32.xlu0 %v3139_v46, %s4849_s26  ;;  %v3149_v51 = vpack.i.bf16 %v1806_v63, %v1643_v6  ;;  %v3154_v54 = vpack.i.bf16 %v1850_v22, %v1687_v8  ;;  %v3159_v49 = vpack.i.bf16 %v1923_v18, %v1646_v60  ;;  %v1894_v27 = vsel %vm1063_vm7, %v1892_v33, %v1893_v38 }
 0x463   : > { %v3169_v56 = vpack.i.bf16 %v1734_v13, %v1894_v27  ;;  %v1896_v32 = vsel %vm1063_vm7, %v1893_v38, %v1895_v39  ;;  %v1690_v43 = vsel %vm854_vm5, %v1688_v21, %v1689_v45  ;;  %v1955_v46 = vsel %vm899_vm6, %v1730_v61, %v3742_v62 }
 0x464   : > { %3150 = vrot.lane.b32.xlu1 %v3149_v51, %s4848_s20  ;;  %v3174_v42 = vpack.i.bf16 %v1896_v32, %v1955_v46  ;;  %v1939_v6 = vsel %vm854_vm5, %v1686_v14, %v3725_v53  ;;  %v1851_v2 = vrot.slane %v4552_v10, 6  ;;  %v1807_v51 = vrot.slane %v4552_v10, 5 }
 0x465   : > { %v3164_v63 = vpack.i.bf16 %v1939_v6, %v1690_v43  ;;  %v1647_v15 = vrot.slane %v4552_v10, 1  ;;  %v1764_v33 = vrot.slane %v4314_v7, 4 }
 0x466   : > { %1819 = vrot.lane.b32.xlu0 %v1803_v3, %s4848_s20  ;;  %v1852_v22 = vsel %vm1018_vm3, %v1849_v57, %v1851_v2  ;;  %v1735_v3 = vrot.slane %v4552_v10, 3  ;;  %v1808_v61 = vsel %vm973_vm4, %v1805_v41, %v1807_v51  ;;  %v1996_v60 = vsel %vm1018_vm3, %v1851_v2, %v3598_v24 }
 0x467   : > { %v1648_v14 = vsel %vm769_vm2, %v1645_v12, %v1647_v15  ;;  %v1924_v52 = vsel %vm769_vm2, %v1647_v15, %v3698_v37  ;;  %v1980_v12 = vsel %vm973_vm4, %v1807_v51, %v3607_v28 }
 0x468   : > { %3155 = vrot.lane.b32.xlu1 %v3154_v54, %s4850_s29  ;;  %v1736_v8 = vsel %vm899_vm6, %v1733_v0, %v1735_v3  ;;  %v3179_v36 = vpack.i.bf16 %v1924_v52, %v1648_v14  ;;  %v1691_v54 = vrot.slane %v4552_v10, 2  ;;  %v1956_v37 = vsel %vm899_vm6, %v1735_v3, %v3742_v62 }
 0x469   : > { %v1969_v14 = vsel %vm944_vm8, %v1764_v33, %v4024_v40 }
 0x46a   : > { %1863 = vrot.lane.b32.xlu0 %v1847_v16, %s4850_s29  ;;  %v1940_v57 = vsel %vm854_vm5, %v1691_v54, %v3725_v53  ;;  %v1692_v41 = vsel %vm854_vm5, %v1689_v45, %v1691_v54  ;;  %v1762_v53 = vrot.slane %v4304_v47, 4  ;;  %v1761_v16 = vrot.slane %v4271_v23, 4 }
 0x46c   : > { %3160 = vrot.lane.b32.xlu1 %v3159_v49, %s4848_s20  ;;  %v1763_v5 = vsel %vm944_vm8, %v1761_v16, %v1762_v53 }
 0x46e   : > { %3145 = vrot.lane.b32.xlu0 %v3144_v1, %s4849_s26 }
 0x470   : > { %3170 = vrot.lane.b32.xlu1 %v3169_v56, %s4849_s26  ;;  %v1765_v56 = vsel %vm944_vm8, %v1762_v53, %v1764_v33 }
 0x472   : > { %1985 = vrot.lane.b32.xlu0 %v1979_v30, %s4848_s20 }
 0x474   : > { %3175 = vrot.lane.b32.xlu1 %v3174_v42, %s4849_s26 }
 0x476   : > { %3165 = vrot.lane.b32.xlu0 %v3164_v63, %s4850_s29 }
 0x478   : > { %1867 = vrot.lane.b32.xlu1 %v1852_v22, %s4850_s29 }
 0x47a   : > { %1823 = vrot.lane.b32.xlu0 %v1808_v61, %s4848_s20 }
 0x47c   : > { %1751 = vrot.lane.b32.xlu1 %v1736_v8, %s4849_s26 }
 0x47e   : > { %3180 = vrot.lane.b32.xlu0 %v3179_v36, %s4848_s20 }
 0x480   : > { %1947 = vrot.lane.b32.xlu1 %v1940_v57, %s4850_s29 }
 0x482   : > { %1707 = vrot.lane.b32.xlu0 %v1692_v41, %s4850_s29  ;;  %v1767_v41 = vrot.slane %v4383_v34, 4 }
 0x484   : > { %1963 = vrot.lane.b32.xlu1 %v1956_v37, %s4849_s26  ;;  %s3190_s26 = scalar_lea.vmem %s3189_s28, 2048 }
 0x486   : > { %1987 = vrot.lane.b32.xlu0 %v1980_v12, %s4848_s20  ;;  %s367_s20 = sand.u32 1, %s3238_s14  }
 0x487   : > { %s2484_s30 = sshll.u32 %s367_s20, 6  ;;  %s4784_s17 = scalar_lea.sflag [#allocation3], %s367_s20 }
 0x488   : > { %s4741_s0 = scalar_lea.vmem [#allocation2], %s2484_s30 }
 0x489   : > { %s2409_s11 = sshll.u32 %s4741_s0, 4  ;;  %s4777_s11 = int_to_ptr.vmem [resolvable:$true] %s2409_s11 }
 0x48a   : > { %2003 = vrot.lane.b32.xlu0 %v1996_v60, %s4850_s29  ;;  %s3184_s1 = scalar_lea.vmem %s4777_s11, 1024  ;;  %p3191_p0 = scmp.lt.s32.totalorder %s4777_s11, %s3189_s28 }
 0x48b   : > { %p3185_p11 = scmp.ne.s32.totalorder %s4777_s11, %s3184_s1  ;;  %p3192_p1 = scmp.lt.s32.totalorder %s3190_s26, %s3184_s1 }
 0x48d   : > { %p3186_p12 = pnand %p3185_p11, %p3349_p5  ;;  %p3193_p2 = por %p3192_p1, %p3191_p0 }
 0x48f   : > { %p3187_p13 = pneg %p3186_p12 }
 0x491   : > { %p3194_p3 = pnand %p3193_p2, %p3187_p13 }
 0x49f   : > { %v3071_v0 = vpop.permute.xlu1 %3070  ;;  %v3066_v38 = vpop.permute.xlu0 %3065 }
 0x4a0   : > { %v3068_v11 = vunpack.i.h.bf16 %v3066_v38  ;;  %v3067_v62 = vunpack.i.l.bf16 %v3066_v38  ;;  %v3073_v55 = vunpack.i.h.bf16 %v3071_v0  ;;  %v3072_v18 = vunpack.i.l.bf16 %v3071_v0 }
 0x4a2   : > { %v2009_v28 = vsel %vm427_vm0, %v4271_v23, %v3068_v11  ;;  %v2033_v24 = vsel %vm427_vm0, %v1763_v5, %v3067_v62  ;;  %v1766_v11 = vrot.slane %v4370_v44, 4 }
 0x4a3   : > { %v1812_v49 = vpop.permute.xlu1 %1811  ;;  %v3076_v1 = vpop.permute.xlu0 %3075  ;;  %v2041_v39 = vsel %vm451_vm1, %v2033_v24, %v3072_v18  ;;  %v2017_v45 = vsel %vm451_vm1, %v2009_v28, %v3073_v55 }
 0x4a4   : > { %v3078_v13 = vunpack.i.h.bf16 %v3076_v1  ;;  %v3077_v27 = vunpack.i.l.bf16 %v3076_v1  ;;  %v2034_v23 = vsel %vm427_vm0, %v1765_v56, %v1812_v49  ;;  %v1768_v5 = vsel %vm944_vm8, %v1766_v11, %v1767_v41 }
 0x4a6   : > { %v2049_v21 = vsel %vm1219_vm9, %v2041_v39, %v3077_v27  ;;  %v2025_v32 = vsel %vm1219_vm9, %v2017_v45, %v3078_v13  ;;  %v1769_v27 = vrot.slane %v4400_v59, 4 }
 0x4a7   : > { %v1856_v30 = vpop.permute.xlu1 %1855  ;;  %2232 = vmatprep.mubr.f32.mxu1 %v2049_v21  ;;  %v1998_v63 = vpop.permute.xlu0 %1997 }
 0x4a8   : > { %v2042_v43 = vsel %vm451_vm1, %v2034_v23, %v1856_v30  ;;  %2233 = vmatmul.mubr.f32.vlgmr.msra.gmra.mrb[32].mxu1 %v2025_v32 }
 0x4a9   : > { %2521 = vmatprep.mubr.msk.f32.mxu0 %vm1219_vm9, %v2042_v43 }
 0x4ab   : > { %v3081_v46 = vpop.permute.xlu1 %3080 }
 0x4ac   : > { %v3082_v42 = vunpack.i.l.bf16 %v3081_v46  ;;  %v3083_v8 = vunpack.i.h.bf16 %v3081_v46 }
 0x4ae   : > { %v2050_v6 = vsel %vm1219_vm9, %v2042_v43, %v3082_v42  ;;  %v1770_v43 = vsel %vm944_vm8, %v1767_v41, %v1769_v27  ;;  %v1772_v42 = vrot.slane %v4455_v9, 4 }
 0x4af   : > { %v1982_v2 = vpop.permute.xlu1 %1981  ;;  %2237 = vmatprep.mubr.f32.mxu1 %v2050_v6 }
 0x4b0   : > { %v2069_v36 = vsel %vm427_vm0, %v1969_v14, %v1982_v2 }
 0x4b1   : > { %v2073_v38 = vsel %vm451_vm1, %v2069_v36, %v1998_v63 }
 0x4b4   : > { %v3101_v51 = vpop.permute.xlu1 %3100  ;;  %v3086_v15 = vpop.permute.xlu0 %3085 }
 0x4b5   : > { %v3087_v22 = vunpack.i.l.bf16 %v3086_v15  ;;  %v3088_v53 = vunpack.i.h.bf16 %v3086_v15  ;;  %v3102_v55 = vunpack.i.l.bf16 %v3101_v51  ;;  %v3103_v56 = vunpack.i.h.bf16 %v3101_v51 }
 0x4b7   : > { %v2010_v54 = vsel %vm427_vm0, %v4304_v47, %v3087_v22  ;;  %v2035_v24 = vsel %vm427_vm0, %v1768_v5, %v3088_v53  ;;  %v1771_v22 = vrot.slane %v4448_v29, 4 }
 0x4b8   : > { %v1816_v3 = vpop.permute.xlu1 %1815  ;;  %v3091_v61 = vpop.permute.xlu0 %3090 }
 0x4b9   : > { %v3092_v52 = vunpack.i.l.bf16 %v3091_v61  ;;  %v3093_v16 = vunpack.i.h.bf16 %v3091_v61  ;;  %v2036_v6 = vsel %vm427_vm0, %v1770_v43, %v1816_v3  ;;  %v1773_v36 = vsel %vm944_vm8, %v1771_v22, %v1772_v42 }
 0x4ba   : > { %v1970_v3 = vsel %vm944_vm8, %v1769_v27, %v4024_v40 }
 0x4bb   : > { %v2018_v57 = vsel %vm451_vm1, %v2010_v54, %v3092_v52  ;;  %v2043_v1 = vsel %vm451_vm1, %v2035_v24, %v3093_v16 }
 0x4bc   : > { %v1984_v37 = vpop.permute.xlu1 %1983  ;;  %v3096_v12 = vpop.permute.xlu0 %3095  ;;  %v2026_v60 = vsel %vm1219_vm9, %v2018_v57, %v3083_v8 }
 0x4bd   : > { %v3097_v0 = vunpack.i.l.bf16 %v3096_v12  ;;  %2238 = vmatmul.mubr.f32.gmra.mrb[34].mxu1 %v2026_v60  ;;  %2338 = vmatmul.mubr.f32.vlgmr.msra.gmra.mrb[16].mxu0 %v2026_v60  ;;  %v3098_v47 = vunpack.i.h.bf16 %v3096_v12 }
 0x4be   : > { %2522 = vmatprep.mubr.msk.f32.mxu0 %vm1219_vm9, %v2073_v38  ;;  %v2070_v38 = vsel %vm427_vm0, %v1970_v3, %v1984_v37 }
 0x4bf   : > { %v2011_v62 = vsel %vm427_vm0, %v4370_v44, %v3097_v0  ;;  %v2057_v44 = vsel %vm427_vm0, %v4314_v7, %v3098_v47 }
 0x4c0   : > { %v3106_v18 = vpop.permute.xlu0 %3105  ;;  %v2000_v49 = vpop.permute.xlu1 %1999  ;;  %v2019_v13 = vsel %vm451_vm1, %v2011_v62, %v3102_v55  ;;  %v2061_v30 = vsel %vm451_vm1, %v2057_v44, %v3103_v56  ;;  %v1774_v44 = vrot.slane %v4501_v35, 4 }
 0x4c1   : > { %v3108_v28 = vunpack.i.h.bf16 %v3106_v18  ;;  %v3107_v33 = vunpack.i.l.bf16 %v3106_v18  ;;  %v2074_v18 = vsel %vm451_vm1, %v2070_v38, %v2000_v49 }
 0x4c3   : > { %v2051_v39 = vsel %vm1219_vm9, %v2043_v1, %v3107_v33  ;;  %v2027_v45 = vsel %vm1219_vm9, %v2019_v13, %v3108_v28 }
 0x4c4   : > { %v3111_v21 = vpop.permute.xlu0 %3110  ;;  %2242 = vmatprep.mubr.f32.mxu1 %v2051_v39 }
 0x4c5   : > { %v3112_v32 = vunpack.i.l.bf16 %v3111_v21  ;;  %2243 = vmatmul.mubr.f32.gmra.mrb[36].mxu1 %v2027_v45  ;;  %v3113_v63 = vunpack.i.h.bf16 %v3111_v21 }
 0x4c6   : > { %v3116_v23 = vpop.permute.xlu1 %3115 }
 0x4c7   : > { %v2065_v46 = vsel %vm1219_vm9, %v2061_v30, %v3112_v32  ;;  %v3118_v2 = vunpack.i.h.bf16 %v3116_v23  ;;  %v3117_v15 = vunpack.i.l.bf16 %v3116_v23 }
 0x4c8   : > { %v1860_v7 = vpop.permute.xlu0 %1859  ;;  %2343 = vmatmul.mubr.f32.gmra.mrb[18].mxu0 %v2065_v46 }
 0x4c9   : > { %v2044_v51 = vsel %vm451_vm1, %v2036_v6, %v1860_v7  ;;  %v2012_v57 = vsel %vm427_vm0, %v4383_v34, %v3117_v15  ;;  %v2037_v41 = vsel %vm427_vm0, %v1773_v36, %v3118_v2  ;;  %v1777_v2 = vrot.slane %v4521_v25, 4 }
 0x4ca   : > { %v3121_v61 = vpop.permute.xlu1 %3120  ;;  %2523 = vmatprep.mubr.msk.f32.mxu0 %vm1219_vm9, %v2044_v51  ;;  %v2052_v14 = vsel %vm1219_vm9, %v2044_v51, %v3113_v63  ;;  %v1776_v51 = vrot.slane %v4515_v58, 4 }
 0x4cb   : > { %v3123_v52 = vunpack.i.h.bf16 %v3121_v61  ;;  %v3122_v8 = vunpack.i.l.bf16 %v3121_v61  ;;  %2247 = vmatprep.mubr.f32.mxu1 %v2052_v14 }
 0x4cc   : > { %v3126_v54 = vpop.permute.xlu0 %3125 }
 0x4cd   : > { %v3128_v12 = vunpack.i.h.bf16 %v3126_v54  ;;  %v3127_v60 = vunpack.i.l.bf16 %v3126_v54  ;;  %v2020_v53 = vsel %vm451_vm1, %v2012_v57, %v3122_v8  ;;  %v2045_v0 = vsel %vm451_vm1, %v2037_v41, %v3123_v52 }
 0x4ce   : > { %v3131_v16 = vpop.permute.xlu1 %3130  ;;  %v1778_v54 = vsel %vm944_vm8, %v1776_v51, %v1777_v2  ;;  %v1971_v41 = vsel %vm944_vm8, %v1774_v44, %v4024_v40 }
 0x4cf   : > { %v3133_v11 = vunpack.i.h.bf16 %v3131_v16  ;;  %v3132_v47 = vunpack.i.l.bf16 %v3131_v16  ;;  %v2028_v62 = vsel %vm1219_vm9, %v2020_v53, %v3127_v60  ;;  %v2053_v55 = vsel %vm1219_vm9, %v2045_v0, %v3128_v12 }
 0x4d0   : > { %v3136_v34 = vpop.permute.xlu0 %3135  ;;  %2248 = vmatmul.mubr.f32.gmra.mrb[38].mxu1 %v2028_v62  ;;  %2348 = vmatmul.mubr.f32.gmra.mrb[20].mxu0 %v2028_v62 }
 0x4d1   : > { %2252 = vmatprep.mubr.f32.mxu1 %v2053_v55  ;;  %2524 = vmatprep.mubr.msk.f32.mxu0 %vm1219_vm9, %v2074_v18  ;;  %v3138_v5 = vunpack.i.h.bf16 %v3136_v34  ;;  %v3137_v28 = vunpack.i.l.bf16 %v3136_v34  ;;  %v2013_v37 = vsel %vm427_vm0, %v4448_v29, %v3132_v47  ;;  %v2058_v24 = vsel %vm427_vm0, %v4400_v59, %v3133_v11 }
 0x4d2   : > { %v2002_v33 = vpop.permute.xlu1 %2001  ;;  %v1775_v29 = vsel %vm944_vm8, %v1772_v42, %v1774_v44  ;;  %v1779_v55 = vrot.slane %v4552_v10, 4 }
 0x4d3   : > { %v2021_v49 = vsel %vm451_vm1, %v2013_v37, %v3137_v28  ;;  %v2062_v39 = vsel %vm451_vm1, %v2058_v24, %v3138_v5 }
 0x4d4   : > { %v3141_v1 = vpop.permute.xlu0 %3140 }
 0x4d5   : > { %v3143_v13 = vunpack.i.h.bf16 %v3141_v1  ;;  %v3142_v27 = vunpack.i.l.bf16 %v3141_v1 }
 0x4d6   : > { %v3151_v45 = vpop.permute.xlu1 %3150 }
 0x4d7   : > { %v2029_v56 = vsel %vm1219_vm9, %v2021_v49, %v3142_v27  ;;  %v2066_v21 = vsel %vm1219_vm9, %v2062_v39, %v3143_v13  ;;  %v3152_v43 = vunpack.i.l.bf16 %v3151_v45  ;;  %v3153_v15 = vunpack.i.h.bf16 %v3151_v45 }
 0x4d8   : > { %v1820_v32 = vpop.permute.xlu0 %1819  ;;  %2253 = vmatmul.mubr.f32.gmra.mrb[40].mxu1 %v2029_v56  ;;  %2353 = vmatmul.mubr.f32.gmra.mrb[22].mxu0 %v2066_v21  ;;  %v1780_v27 = vsel %vm944_vm8, %v1777_v2, %v1779_v55 }
 0x4d9   : > { %v2038_v23 = vsel %vm427_vm0, %v1775_v29, %v1820_v32  ;;  %v2014_v14 = vsel %vm427_vm0, %v4455_v9, %v3152_v43  ;;  %v2039_v60 = vsel %vm427_vm0, %v1778_v54, %v3153_v15 }
 0x4da   : > { %v3156_v59 = vpop.permute.xlu1 %3155 }
 0x4db   : > { %v3157_v6 = vunpack.i.l.bf16 %v3156_v59  ;;  %v3158_v22 = vunpack.i.h.bf16 %v3156_v59 }
 0x4dc   : > { %v1864_v30 = vpop.permute.xlu0 %1863 }
 0x4dd   : > { %v2046_v46 = vsel %vm451_vm1, %v2038_v23, %v1864_v30  ;;  %v2022_v52 = vsel %vm451_vm1, %v2014_v14, %v3157_v6  ;;  %v2047_v53 = vsel %vm451_vm1, %v2039_v60, %v3158_v22 }
 0x4de   : > { %2525 = vmatprep.mubr.msk.f32.mxu0 %vm1219_vm9, %v2046_v46  ;;  %v3161_v63 = vpop.permute.xlu1 %3160 }
 0x4df   : > { %v3163_v0 = vunpack.i.h.bf16 %v3161_v63  ;;  %v3162_v38 = vunpack.i.l.bf16 %v3161_v63 }
 0x4e0   : > { %v3146_v7 = vpop.permute.xlu0 %3145 }
 0x4e1   : > { %v3148_v61 = vunpack.i.h.bf16 %v3146_v7  ;;  %v3147_v42 = vunpack.i.l.bf16 %v3146_v7  ;;  %v2015_v37 = vsel %vm427_vm0, %v4515_v58, %v3162_v38  ;;  %v2059_v24 = vsel %vm427_vm0, %v4501_v35, %v3163_v0 }
 0x4e2   : > { %v3171_v8 = vpop.permute.xlu1 %3170  ;;  %v1972_v7 = vsel %vm944_vm8, %v1779_v55, %v4024_v40  ;;  %v4735_v40 = vld [vmem:[%s4834_s9] ss:$0 sm:$0xff] }
 0x4e3   : > { %v2054_v36 = vsel %vm1219_vm9, %v2046_v46, %v3147_v42  ;;  %v2030_v3 = vsel %vm1219_vm9, %v2022_v52, %v3148_v61  ;;  %v3172_v57 = vunpack.i.l.bf16 %v3171_v8  ;;  %v3173_v5 = vunpack.i.h.bf16 %v3171_v8 }
 0x4e4   : > { %v1986_v12 = vpop.permute.xlu0 %1985  ;;  %2257 = vmatprep.mubr.f32.mxu1 %v2054_v36  ;;  %2358 = vmatmul.mubr.f32.gmra.mrb[24].mxu0 %v2030_v3 }
 0x4e5   : > { %v2071_v9 = vsel %vm427_vm0, %v1971_v41, %v1986_v12  ;;  %2258 = vmatmul.mubr.f32.gmra.mrb[42].mxu1 %v2030_v3  ;;  %v2055_v16 = vsel %vm1219_vm9, %v2047_v53, %v3172_v57 }
 0x4e6   : > { %v2075_v11 = vsel %vm451_vm1, %v2071_v9, %v2002_v33  ;;  %v3176_v47 = vpop.permute.xlu1 %3175  ;;  %2262 = vmatprep.mubr.f32.mxu1 %v2055_v16 }
 0x4e7   : > { %2526 = vmatprep.mubr.msk.f32.mxu0 %vm1219_vm9, %v2075_v11  ;;  %v3177_v28 = vunpack.i.l.bf16 %v3176_v47  ;;  %v3178_v44 = vunpack.i.h.bf16 %v3176_v47 }
 0x4e8   : > { %v3166_v62 = vpop.permute.xlu0 %3165 }
 0x4e9   : > { %v3168_v18 = vunpack.i.h.bf16 %v3166_v62  ;;  %v3167_v34 = vunpack.i.l.bf16 %v3166_v62 }
 0x4ea   : > { %v1868_v1 = vpop.permute.xlu1 %1867 }
 0x4eb   : > { %v2023_v33 = vsel %vm451_vm1, %v2015_v37, %v3167_v34  ;;  %v2063_v13 = vsel %vm451_vm1, %v2059_v24, %v3168_v18 }
 0x4ec   : > { %v1824_v49 = vpop.permute.xlu0 %1823  ;;  %v2031_v39 = vsel %vm1219_vm9, %v2023_v33, %v3173_v5  ;;  %v2067_v45 = vsel %vm1219_vm9, %v2063_v13, %v3177_v28 }
 0x4ed   : > { %v2040_v56 = vsel %vm427_vm0, %v1780_v27, %v1824_v49  ;;  %2263 = vmatmul.mubr.f32.gmra.mrb[44].mxu1 %v2031_v39  ;;  %2363 = vmatmul.mubr.f32.gmra.mrb[26].mxu0 %v2067_v45 }
 0x4ee   : > { %v2048_v58 = vsel %vm451_vm1, %v2040_v56, %v1868_v1  ;;  %v1752_v35 = vpop.permute.xlu1 %1751 }
 0x4ef   : > { %2527 = vmatprep.mubr.msk.f32.mxu0 %vm1219_vm9, %v2048_v58  ;;  %v2056_v21 = vsel %vm1219_vm9, %v2048_v58, %v3178_v44 }
 0x4f0   : > { %v3181_v32 = vpop.permute.xlu0 %3180  ;;  %2267 = vmatprep.mubr.f32.mxu1 %v2056_v21 }
 0x4f1   : > { %v3182_v29 = vunpack.i.l.bf16 %v3181_v32  ;;  %v3183_v46 = vunpack.i.h.bf16 %v3181_v32 }
 0x4f2   : > { %v1948_v30 = vpop.permute.xlu1 %1947 }
 0x4f3   : > { %v2016_v59 = vsel %vm427_vm0, %v4521_v25, %v3182_v29  ;;  %v2060_v2 = vsel %vm427_vm0, %v4552_v10, %v3183_v46 }
 0x4f4   : > { %v1708_v23 = vpop.permute.xlu0 %1707  ;;  %v2064_v22 = vsel %vm451_vm1, %v2060_v2, %v1948_v30 }
 0x4f5   : > { %v2024_v43 = vsel %vm451_vm1, %v2016_v59, %v1708_v23 }
 0x4f6   : > { %v2032_v6 = vsel %vm1219_vm9, %v2024_v43, %v1752_v35  ;;  %v1964_v15 = vpop.permute.xlu1 %1963 }
 0x4f7   : > { %2268 = vmatmul.mubr.f32.gmra.mrb[46].mxu1 %v2032_v6  ;;  %2368 = vmatmul.mubr.f32.gmra.mrb[28].mxu0 %v2032_v6  ;;  %v2068_v42 = vsel %vm1219_vm9, %v2064_v22, %v1964_v15 }
 0x4f8   : > { %v1988_v63 = vpop.permute.xlu0 %1987 }
 0x4f9   : > { %v2072_v25 = vsel %vm427_vm0, %v1972_v7, %v1988_v63 }
 0x4fc   : > { %v2004_v51 = vpop.permute.xlu0 %2003 }
 0x4fd   : > { %v2076_v61 = vsel %vm451_vm1, %v2072_v25, %v2004_v51 }
 0x4fe   : > { %2528 = vmatprep.mubr.msk.f32.mxu0 %vm1219_vm9, %v2076_v61 }
 0x4ff   : > { %2373 = vmatmul.mubr.f32.gmra.mrb[30].mxu0 %v2068_v42 }
 0x57b   : > { %v2654_v14 = vpop.f32.mrb[32].mxu1 }
 0x57c   : > { %v2655_v52 = vpop.f32.mrb[33].mxu1 }
 0x57d   : > { %v2656_v8 = vadd.f32 %v2655_v52, %v2654_v14 }
 0x57f   : > { %v2235_v10 = vadd.f32 %v2656_v8, %v4735_v40 }
 0x590   : > { %v2657_v36 = vpop.f32.mrb[34].mxu1  ;;  %v2339_v3 = vpop.f32.mrb[16].mxu0 }
 0x591   : > { %v2340_v54 = vadd.f32 %v2339_v3, %v2235_v10  ;;  %v2658_v57 = vpop.f32.mrb[35].mxu1  ;;  %v2341_v41 = vpop.f32.mrb[17].mxu0 }
 0x592   : > { %v2659_v12 = vadd.f32 %v2658_v57, %v2657_v36 }
 0x593   : > { %v2378_v60 = vadd.f32 %v2340_v54, %v3592_v19 }
 0x594   : > { %v2240_v38 = vadd.f32 %v2659_v12, %v4735_v40 }
 0x595   : > { %2386 = vst.msk [vmem:[%s4741_s0] sm:$0xff] %vm427_vm0, %v2378_v60 }
 0x598   : > { %v2660_v9 = vpop.f32.mrb[36].mxu1 }
 0x599   : > { %v2661_v53 = vpop.f32.mrb[37].mxu1 }
 0x59a   : > { %v2662_v0 = vadd.f32 %v2661_v53, %v2660_v9 }
 0x59b   : > { %v2344_v16 = vpop.f32.mrb[18].mxu0 }
 0x59c   : > { %v2345_v11 = vadd.f32 %v2344_v16, %v2240_v38  ;;  %v2346_v47 = vpop.f32.mrb[19].mxu0  ;;  %v2245_v19 = vadd.f32 %v2662_v0, %v4735_v40 }
 0x59e   : > { %v2379_v62 = vadd.f32 %v2345_v11, %v3589_v17 }
 0x5a0   : > { %2387 = vst.msk [vmem:[%s4741_s0 + $0x8] sm:$0xff] %vm427_vm0, %v2379_v62 }
 0x5a3   : > { %v2663_v55 = vpop.f32.mrb[38].mxu1  ;;  %v2349_v18 = vpop.f32.mrb[20].mxu0 }
 0x5a4   : > { %v2350_v34 = vadd.f32 %v2349_v18, %v2245_v19  ;;  %v2664_v5 = vpop.f32.mrb[39].mxu1  ;;  %v2351_v28 = vpop.f32.mrb[21].mxu0 }
 0x5a5   : > { %v2665_v37 = vadd.f32 %v2664_v5, %v2663_v55 }
 0x5a6   : > { %v2380_v24 = vadd.f32 %v2350_v34, %v3616_v31 }
 0x5a7   : > { %v2250_v1 = vadd.f32 %v2665_v37, %v4735_v40 }
 0x5a8   : > { %2388 = vst.msk [vmem:[%s4741_s0 + $0x10] sm:$0xff] %vm427_vm0, %v2380_v24 }
 0x5ab   : > { %v2666_v33 = vpop.f32.mrb[40].mxu1  ;;  %v2354_v17 = vpop.f32.mrb[22].mxu0 }
 0x5ac   : > { %v2355_v13 = vadd.f32 %v2354_v17, %v2250_v1  ;;  %v2667_v27 = vpop.f32.mrb[41].mxu1  ;;  %v2356_v49 = vpop.f32.mrb[23].mxu0 }
 0x5ad   : > { %v2668_v39 = vadd.f32 %v2667_v27, %v2666_v33 }
 0x5ae   : > { %v2381_v45 = vadd.f32 %v2355_v13, %v3604_v26 }
 0x5af   : > { %v2255_v44 = vadd.f32 %v2668_v39, %v4735_v40 }
 0x5b0   : > { %2389 = vst.msk [vmem:[%s4741_s0 + $0x18] sm:$0xff] %vm427_vm0, %v2381_v45 }
 0x5b7   : > { %v2359_v56 = vpop.f32.mrb[24].mxu0 }
 0x5b8   : > { %v2360_v31 = vadd.f32 %v2359_v56, %v2255_v44  ;;  %v2669_v58 = vpop.f32.mrb[42].mxu1  ;;  %v2361_v35 = vpop.f32.mrb[25].mxu0 }
 0x5b9   : > { %v2670_v21 = vpop.f32.mrb[43].mxu1 }
 0x5ba   : > { %v2382_v32 = vadd.f32 %v2360_v31, %v3719_v50  ;;  %v2671_v29 = vadd.f32 %v2670_v21, %v2669_v58 }
 0x5bc   : > { %2390 = vst.msk [vmem:[%s4741_s0 + $0x20] sm:$0xff] %vm427_vm0, %v2382_v32  ;;  %v2260_v59 = vadd.f32 %v2671_v29, %v4735_v40 }
 0x5c0   : > { %v2672_v23 = vpop.f32.mrb[44].mxu1  ;;  %v2364_v26 = vpop.f32.mrb[26].mxu0 }
 0x5c1   : > { %v2365_v30 = vadd.f32 %v2364_v26, %v2260_v59  ;;  %v2673_v43 = vpop.f32.mrb[45].mxu1  ;;  %v2366_v46 = vpop.f32.mrb[27].mxu0 }
 0x5c2   : > { %v2674_v6 = vadd.f32 %v2673_v43, %v2672_v23 }
 0x5c3   : > { %v2383_v63 = vadd.f32 %v2365_v30, %v3715_v48 }
 0x5c4   : > { %v2265_v50 = vadd.f32 %v2674_v6, %v4735_v40 }
 0x5c5   : > { %2391 = vst.msk [vmem:[%s4741_s0 + $0x28] sm:$0xff] %vm427_vm0, %v2383_v63 }
 0x5ca   : > { %v2675_v2 = vpop.f32.mrb[46].mxu1  ;;  %v2369_v15 = vpop.f32.mrb[28].mxu0 }
 0x5cb   : > { %v2370_v7 = vadd.f32 %v2369_v15, %v2265_v50  ;;  %v2676_v25 = vpop.f32.mrb[47].mxu1  ;;  %v2371_v51 = vpop.f32.mrb[29].mxu0 }
 0x5cc   : > { %v2677_v22 = vadd.f32 %v2676_v25, %v2675_v2 }
 0x5cd   : > { %v2384_v61 = vadd.f32 %v2370_v7, %v3773_v4 }
 0x5ce   : > { %v2270_v42 = vadd.f32 %v2677_v22, %v4735_v40 }
 0x5cf   : > { %2392 = vst.msk [vmem:[%s4741_s0 + $0x30] sm:$0xff] %vm427_vm0, %v2384_v61 }
 0x5d2   : > { %v2374_v48 = vpop.f32.mrb[30].mxu0 }
 0x5d3   : > { %v2375_v14 = vadd.f32 %v2374_v48, %v2270_v42  ;;  %v2376_v52 = vpop.f32.mrb[31].mxu0 }
 0x5d5   : > { %v2385_v4 = vadd.f32 %v2375_v14, %v3769_v20 }
 0x5d7   : > { %2393 = vst.msk [vmem:[%s4741_s0 + $0x38] sm:$0xff] %vm427_vm0, %v2385_v4 }
 0x5d8   : > { %3197 = shalt.err (!%p3194_p3)
}
 0x5d9   : > { %s3198_s20 = scalar_lea.hbm %s4775_s27, 1024  ;;  %s3202_s0 = scalar_lea.hbm %s4835_s10, 2048 }
 0x5da   : > { %p3199_p4 = scmp.ne.s32.totalorder %s4775_s27, %s3198_s20  ;;  %p3203_p9 = scmp.lt.u32.totalorder %s4775_s27, %s4835_s10 }
 0x5db   : > { %p3204_p10 = scmp.lt.u32.totalorder %s3202_s0, %s3198_s20  ;;  %p3206_p12 = scmp.lt.u32.totalorder %s3198_s20, %s4775_s27 }
 0x5dc   : > { %p3200_p7 = pnand %p3199_p4, %p3349_p5 }
 0x5dd   : > { %p3205_p11 = por %p3204_p10, %p3203_p9 }
 0x5de   : > { %p3201_p8 = pneg %p3200_p7 }
 0x5df   : > { %p3207_p13 = por %p3206_p12, %p3205_p11 }
 0x5e1   : > { %p3208_p0 = pnand %p3207_p13, %p3201_p8 }
 0x5e3   : > { %3211 = shalt.err (!%p3208_p0)
}
 0x5e4   : > { %s3254_s12 = smov 128   ;;  %s3255_s1 = smov 8  }
 0x5e5   : > { %2898 = dma.vmem_to_hbm [thread:$0]  (%p3349_p5), %s4777_s11, 1024, %s4775_s27, %s4784_s17, %s3254_s12, %s3254_s12, %s3255_s1  }
 0x5e6 PF: > { %p2904_p1 = scmp.ge.s32.totalorder %s3246_s16, 2  ;;  %s2424_s21 = sand.u32 1, %s3234_s13  }
 0x5e7   : > { %s2425_s28 = scalar_lea.sflag [#allocation3], %s2424_s21 }
 0x5e8   : > { %p2901_p2 = pnand %p2904_p1, %p3353_p6 }
 0x5ea   : > { %3229 = dma.done.wait (!%p2901_p2), %s2425_s28, 1024  }
 0x5eb   : > { %3231 = vsyncadd (!%p2901_p2), %s2425_s28, 4294966272  ;;  %p20_p3 = scmp.ge.s32.totalorder %s3336_s19, 4   ;;  %s4851_s13 = smov %s3238_s14 }
 0x5ec   : > { %s4852_s14 = smov %s3242_s15  ;;  %s4853_s15 = smov %s3347_s22 }
 0x5ed   : > { %s4854_s16 = smov %s3336_s19  ;;  %22 = sbr.rel (!%p20_p3) target bundleno = 6 (0x6), region = 98 }
 0x5f4   :  { %2430 = vsyncpa [#allocation3], 1 }
 0x5f5   :  { %2432 = vsyncpa [#allocation3 + $0x1], 1 }

</bundles_post_ra>
